<compile_context>
chip_gen: v5e
topology: v5e:2x2
jax: 0.10.0
libtpu: 0.0.40
codegen_flags: <defaults>
</compile_context>

<pallas_src>
import functools

import jax
import jax.numpy as jnp
from jax import lax
from jax.experimental import pallas as pl
from jax.experimental.pallas import tpu as pltpu


def _dsc_block_kernel(x_ref, masks_ref, sel_ref,
                      wd1_ref, wp1_ref, b1_ref,
                      wd2_ref, wp2_ref, b2_ref,
                      wd3_ref, wp3_ref, b3_ref,
                      o_ref, *, shifts, eps):
    """One batch tile: x_ref (TB*Cin, H*W) -> o_ref (TB*Cout, H_out*W)."""
    masks = masks_ref[...]                              # (taps, P) 0/1 f32

    def depthwise(x, wd_ref):
        # x: (R, P) f32; wd_ref: (R, taps).  "Same"-padded depthwise conv:
        # each tap = lane roll (XLU) + boundary mask + per-row scale (VPU).
        wd = wd_ref[...]
        acc = jnp.zeros(x.shape, jnp.float32)
        for k, shift in enumerate(shifts):              # static unroll
            shifted = x if shift == 0 else pltpu.roll(x, shift, axis=1)
            acc = acc + shifted * masks[k:k + 1, :] * wd[:, k:k + 1]
        return acc

    def pointwise(y, wp_ref, b_ref):
        # 1x1 conv over the batch tile == one block-diagonal MXU matmul
        # (TB*Cout, TB*Cin) @ (TB*Cin, P) + fused (depthwise+pointwise) bias.
        return jnp.dot(wp_ref[...], y,
                       preferred_element_type=jnp.float32) + b_ref[...]

    x = x_ref[...].astype(jnp.float32)                  # (TB*Cin, P)

    # conv1 + ReLU   (dropout: identity at inference)
    y = jnp.maximum(pointwise(depthwise(x, wd1_ref), wp1_ref, b1_ref), 0.0)
    # conv2 + ReLU
    y = jnp.maximum(pointwise(depthwise(y, wd2_ref), wp2_ref, b2_ref), 0.0)
    # InstanceNorm2d(eps, affine=False): per-(batch, channel) stats over H*W
    # (lane reductions + lane broadcasts only, rows are independent).
    mean = jnp.mean(y, axis=1, keepdims=True)
    var = jnp.mean(jnp.square(y - mean), axis=1, keepdims=True)
    y = (y - mean) * lax.rsqrt(var + eps)
    # conv3, depthwise stride (stride_h, 1): depthwise at stride 1, keep every
    # stride_h-th row via a 0/1 selection matmul (stays on the MXU / in VMEM),
    # then the pointwise matmul + bias on the already-halved spatial extent.
    d3 = depthwise(y, wd3_ref)                          # (TB*Cout, P)
    d3 = jnp.dot(d3, sel_ref[...],
                 preferred_element_type=jnp.float32)    # (TB*Cout, P_out)
    o_ref[...] = pointwise(d3, wp3_ref, b3_ref).astype(o_ref.dtype)


def dsc_block_forward(x_nchw, conv1, conv2, conv3, stride=(2, 1), eps=1e-3,
                      batch_tile=None):
    """DSCBlock forward (inference).  x_nchw: (B, Cin, H, W) float32.

    Each conv* is (depth_w (C,1,KH,KW), depth_b (C,), point_w (Co,C,1,1),
    point_b (Co,)) in PyTorch layouts.  Returns (B, Cout, H_out, W).
    """
    B, Cin, H, W = x_nchw.shape
    KH, KW = conv1[0].shape[2], conv1[0].shape[3]
    assert KH % 2 == 1 and KW % 2 == 1, "only the odd-kernel DepthSepConv2D path"
    stride_h, stride_w = stride
    assert stride_w == 1, "only stride (s, 1) implemented (DSCBlock default (2, 1))"
    Cout = conv1[2].shape[0]
    pad_h, pad_w = (KH - 1) // 2, (KW - 1) // 2
    H_out = (H + 2 * pad_h - KH) // stride_h + 1
    P, P_out = H * W, H_out * W

    # --- batch tile: whole batch per grid step if it comfortably fits VMEM ---
    if batch_tile is None:
        per_b = (Cin + 6 * Cout) * P * 4                 # rough f32 activation bytes
        budget = 8 << 20
        batch_tile = B
        if B * per_b > budget:
            batch_tile = B
            for tb in range(B, 0, -1):
                ok_layout = (tb == B) or ((tb * Cin) % 8 == 0 and
                                          (tb * Cout) % 8 == 0)
                if B % tb == 0 and ok_layout and tb * per_b <= budget:
                    batch_tile = tb
                    break
    TB = batch_tile
    assert B % TB == 0
    if TB < B:
        # (8,128) block rule on the sublane axis when the block != full array.
        assert (TB * Cin) % 8 == 0 and (TB * Cout) % 8 == 0

    # --- trace-time weight prep: tap-major depthwise weights (replicated per
    # batch tile), block-diagonal pointwise weights, depthwise bias folded into
    # the pointwise bias (b_fused = Wpw @ b_dw + b_pw) ---
    def prep(params):
        wd, bd, wp, bp = params
        c_in, c_out = wd.shape[0], wp.shape[0]
        wd2 = jnp.tile(wd.reshape(c_in, KH * KW).astype(jnp.float32), (TB, 1))
        wpt = wp.reshape(c_out, c_in).astype(jnp.float32)
        wpb = jnp.kron(jnp.eye(TB, dtype=jnp.float32), wpt)      # block-diag
        b_fused = wpt @ bd.astype(jnp.float32) + bp.astype(jnp.float32)
        b_rep = jnp.tile(b_fused.reshape(c_out, 1), (TB, 1))
        return wd2, wpb, b_rep

    wd1, wp1, b1 = prep(conv1)
    wd2, wp2, b2 = prep(conv2)
    wd3, wp3, b3 = prep(conv3)

    # --- trace-time constants: per-tap boundary masks + static lane shifts,
    # and the stride-row 0/1 selection matrix (DMA'd once, reused) ---
    p_idx = jnp.arange(P, dtype=jnp.int32)
    h_idx, w_idx = p_idx // W, p_idx % W
    mask_rows, shifts = [], []
    for kh in range(KH):
        for kw in range(KW):
            dh, dw = kh - pad_h, kw - pad_w
            valid = ((h_idx + dh >= 0) & (h_idx + dh < H) &
                     (w_idx + dw >= 0) & (w_idx + dw < W))
            mask_rows.append(valid.astype(jnp.float32))
            shifts.append((-(dh * W + dw)) % P)
    masks = jnp.stack(mask_rows, axis=0)                          # (taps, P)

    src = jnp.arange(P, dtype=jnp.int32)[:, None]
    dst = jnp.arange(P_out, dtype=jnp.int32)[None, :]
    sel = ((src // W == stride_h * (dst // W)) &
           (src % W == dst % W)).astype(jnp.float32)              # (P, P_out)

    # Free, metadata-only reshape: stays NCHW, no transpose / pad in HBM.
    x2d = x_nchw.reshape(B * Cin, P)

    kernel = functools.partial(_dsc_block_kernel, shifts=tuple(shifts), eps=eps)

    def const_spec(shape):
        return pl.BlockSpec(shape, lambda i: (0, 0))

    out2d = pl.pallas_call(
        kernel,
        out_shape=jax.ShapeDtypeStruct((B * Cout, P_out), jnp.float32),
        grid=(B // TB,),
        in_specs=[
            pl.BlockSpec((TB * Cin, P), lambda i: (i, 0)),
            const_spec((KH * KW, P)),
            const_spec((P, P_out)),
            const_spec((TB * Cin, KH * KW)),
            const_spec((TB * Cout, TB * Cin)),
            const_spec((TB * Cout, 1)),
            const_spec((TB * Cout, KH * KW)),
            const_spec((TB * Cout, TB * Cout)),
            const_spec((TB * Cout, 1)),
            const_spec((TB * Cout, KH * KW)),
            const_spec((TB * Cout, TB * Cout)),
            const_spec((TB * Cout, 1)),
        ],
        out_specs=pl.BlockSpec((TB * Cout, P_out), lambda i: (i, 0)),
        compiler_params=pltpu.CompilerParams(
            dimension_semantics=("parallel",)),
    )(x2d, masks, sel, wd1, wp1, b1, wd2, wp2, b2, wd3, wp3, b3)

    return out2d.reshape(B, Cout, H_out, W)


def _dsc_block_reference(x, conv1, conv2, conv3, stride=(2, 1), eps=1e-3):
    """Pure-JAX reference matching the PyTorch DSCBlock forward (eval mode)."""
    def ds_conv(x, params, strides):
        wd, bd, wp, bp = params
        c = x.shape[1]
        kh, kw = wd.shape[2], wd.shape[3]
        pad = [((kh - 1) // 2,) * 2, ((kw - 1) // 2,) * 2]
        y = lax.conv_general_dilated(
            x, wd, window_strides=strides, padding=pad,
            dimension_numbers=("NCHW", "OIHW", "NCHW"),
            feature_group_count=c, precision=lax.Precision.HIGHEST)
        y = y + bd.reshape(1, -1, 1, 1)
        z = lax.conv_general_dilated(
            y, wp, window_strides=(1, 1), padding="VALID",
            dimension_numbers=("NCHW", "OIHW", "NCHW"),
            precision=lax.Precision.HIGHEST)
        return z + bp.reshape(1, -1, 1, 1)

    y = jax.nn.relu(ds_conv(x, conv1, (1, 1)))
    y = jax.nn.relu(ds_conv(y, conv2, (1, 1)))
    mean = jnp.mean(y, axis=(2, 3), keepdims=True)
    var = jnp.var(y, axis=(2, 3), keepdims=True)     # biased, like InstanceNorm2d
    y = (y - mean) / jnp.sqrt(var + eps)
    return ds_conv(y, conv3, stride)


if __name__ == "__main__":
    B, in_c, out_c, H, W = 2, 4, 8, 16, 16
    KH, KW = 3, 3

    key = jax.random.PRNGKey(0)
    k_x, k1, k2, k3 = jax.random.split(key, 4)
    x = jax.random.normal(k_x, (B, in_c, H, W), dtype=jnp.float32)

    def make_conv(k, cin, cout):
        ka, kb, kc, kd = jax.random.split(k, 4)
        wd = 0.1 * jax.random.normal(ka, (cin, 1, KH, KW), jnp.float32)   # depth_conv.weight
        bd = 0.1 * jax.random.normal(kb, (cin,), jnp.float32)             # depth_conv.bias
        wp = 0.1 * jax.random.normal(kc, (cout, cin, 1, 1), jnp.float32)  # point_conv.weight
        bp = 0.1 * jax.random.normal(kd, (cout,), jnp.float32)            # point_conv.bias
        return wd, bd, wp, bp

    conv1 = make_conv(k1, in_c, out_c)
    conv2 = make_conv(k2, out_c, out_c)
    conv3 = make_conv(k3, out_c, out_c)

    out = dsc_block_forward(x, conv1, conv2, conv3, stride=(2, 1))
    out = jax.block_until_ready(out)

    ref = jax.block_until_ready(
        _dsc_block_reference(x, conv1, conv2, conv3, stride=(2, 1)))

    H_out = (H + 2 - KH) // 2 + 1
    assert out.shape == (B, out_c, H_out, W), out.shape
    assert ref.shape == out.shape, (ref.shape, out.shape)
    assert jnp.allclose(out, ref, atol=1e-3, rtol=1e-3), \
        float(jnp.max(jnp.abs(out - ref)))

    print("KERNEL_OK")
</pallas_src>

<mosaic_0001>
module attributes {stable_mosaic.version = 11 : i64} {
  func.func @_dsc_block_kernel(%arg0: i32, %arg1: memref<8x256xf32, #tpu.memory_space<vmem>>, %arg2: memref<9x256xf32, #tpu.memory_space<vmem>>, %arg3: memref<256x128xf32, #tpu.memory_space<vmem>>, %arg4: memref<8x9xf32, #tpu.memory_space<vmem>>, %arg5: memref<16x8xf32, #tpu.memory_space<vmem>>, %arg6: memref<16x1xf32, #tpu.memory_space<vmem>>, %arg7: memref<16x9xf32, #tpu.memory_space<vmem>>, %arg8: memref<16x16xf32, #tpu.memory_space<vmem>>, %arg9: memref<16x1xf32, #tpu.memory_space<vmem>>, %arg10: memref<16x9xf32, #tpu.memory_space<vmem>>, %arg11: memref<16x16xf32, #tpu.memory_space<vmem>>, %arg12: memref<16x1xf32, #tpu.memory_space<vmem>>, %arg13: memref<16x128xf32, #tpu.memory_space<vmem>>) attributes {dimension_semantics = [#tpu.dimension_semantics<parallel>], iteration_bounds = array<i64: 1>, scalar_prefetch = 0 : i64, scratch_operands = 0 : i64, tpu.core_type = #tpu.core_type<tc>, window_params = [{transform_indices = @transform_0, window_bounds = array<i64: 8, 256>}, {pipeline_mode = #tpu.pipeline_mode<synchronous>, transform_indices = @transform_1, window_bounds = array<i64: 9, 256>}, {pipeline_mode = #tpu.pipeline_mode<synchronous>, transform_indices = @transform_2, window_bounds = array<i64: 256, 128>}, {pipeline_mode = #tpu.pipeline_mode<synchronous>, transform_indices = @transform_3, window_bounds = array<i64: 8, 9>}, {pipeline_mode = #tpu.pipeline_mode<synchronous>, transform_indices = @transform_4, window_bounds = array<i64: 16, 8>}, {pipeline_mode = #tpu.pipeline_mode<synchronous>, transform_indices = @transform_5, window_bounds = array<i64: 16, 1>}, {pipeline_mode = #tpu.pipeline_mode<synchronous>, transform_indices = @transform_6, window_bounds = array<i64: 16, 9>}, {pipeline_mode = #tpu.pipeline_mode<synchronous>, transform_indices = @transform_7, window_bounds = array<i64: 16, 16>}, {pipeline_mode = #tpu.pipeline_mode<synchronous>, transform_indices = @transform_8, window_bounds = array<i64: 16, 1>}, {pipeline_mode = #tpu.pipeline_mode<synchronous>, transform_indices = @transform_9, window_bounds = array<i64: 16, 9>}, {pipeline_mode = #tpu.pipeline_mode<synchronous>, transform_indices = @transform_10, window_bounds = array<i64: 16, 16>}, {pipeline_mode = #tpu.pipeline_mode<synchronous>, transform_indices = @transform_11, window_bounds = array<i64: 16, 1>}, {transform_indices = @transform_12, window_bounds = array<i64: 16, 128>}]} {
    %c0 = arith.constant 0 : index
    %c0_0 = arith.constant 0 : index
    %0 = vector.load %arg2[%c0, %c0_0] : memref<9x256xf32, #tpu.memory_space<vmem>>, vector<9x256xf32>
    %c0_1 = arith.constant 0 : index
    %c0_2 = arith.constant 0 : index
    %1 = vector.load %arg1[%c0_1, %c0_2] : memref<8x256xf32, #tpu.memory_space<vmem>>, vector<8x256xf32>
    %c0_3 = arith.constant 0 : index
    %c0_4 = arith.constant 0 : index
    %2 = vector.load %arg4[%c0_3, %c0_4] : memref<8x9xf32, #tpu.memory_space<vmem>>, vector<8x9xf32>
    %cst = arith.constant 0.000000e+00 : f32
    %3 = vector.broadcast %cst : f32 to vector<8x256xf32>
    %c17_i32 = arith.constant 17 : i32
    %4 = tpu.dynamic_rotate %1 by %c17_i32 dim 1 : vector<8x256xf32>, i32 -> vector<8x256xf32>
    %5 = vector.extract_strided_slice %0 {offsets = [0, 0], sizes = [1, 256], strides = [1, 1]} : vector<9x256xf32> to vector<1x256xf32>
    %6 = vector.broadcast %5 : vector<1x256xf32> to vector<8x256xf32>
    %7 = arith.mulf %4, %6 : vector<8x256xf32>
    %8 = vector.extract_strided_slice %2 {offsets = [0, 0], sizes = [8, 1], strides = [1, 1]} : vector<8x9xf32> to vector<8x1xf32>
    %9 = vector.broadcast %8 : vector<8x1xf32> to vector<8x256xf32>
    %10 = arith.mulf %7, %9 : vector<8x256xf32>
    %11 = arith.addf %3, %10 : vector<8x256xf32>
    %c16_i32 = arith.constant 16 : i32
    %12 = tpu.dynamic_rotate %1 by %c16_i32 dim 1 : vector<8x256xf32>, i32 -> vector<8x256xf32>
    %13 = vector.extract_strided_slice %0 {offsets = [1, 0], sizes = [1, 256], strides = [1, 1]} : vector<9x256xf32> to vector<1x256xf32>
    %14 = vector.broadcast %13 : vector<1x256xf32> to vector<8x256xf32>
    %15 = arith.mulf %12, %14 : vector<8x256xf32>
    %16 = vector.extract_strided_slice %2 {offsets = [0, 1], sizes = [8, 1], strides = [1, 1]} : vector<8x9xf32> to vector<8x1xf32>
    %17 = vector.broadcast %16 : vector<8x1xf32> to vector<8x256xf32>
    %18 = arith.mulf %15, %17 : vector<8x256xf32>
    %19 = arith.addf %11, %18 : vector<8x256xf32>
    %c15_i32 = arith.constant 15 : i32
    %20 = tpu.dynamic_rotate %1 by %c15_i32 dim 1 : vector<8x256xf32>, i32 -> vector<8x256xf32>
    %21 = vector.extract_strided_slice %0 {offsets = [2, 0], sizes = [1, 256], strides = [1, 1]} : vector<9x256xf32> to vector<1x256xf32>
    %22 = vector.broadcast %21 : vector<1x256xf32> to vector<8x256xf32>
    %23 = arith.mulf %20, %22 : vector<8x256xf32>
    %24 = vector.extract_strided_slice %2 {offsets = [0, 2], sizes = [8, 1], strides = [1, 1]} : vector<8x9xf32> to vector<8x1xf32>
    %25 = vector.broadcast %24 : vector<8x1xf32> to vector<8x256xf32>
    %26 = arith.mulf %23, %25 : vector<8x256xf32>
    %27 = arith.addf %19, %26 : vector<8x256xf32>
    %c1_i32 = arith.constant 1 : i32
    %28 = tpu.dynamic_rotate %1 by %c1_i32 dim 1 : vector<8x256xf32>, i32 -> vector<8x256xf32>
    %29 = vector.extract_strided_slice %0 {offsets = [3, 0], sizes = [1, 256], strides = [1, 1]} : vector<9x256xf32> to vector<1x256xf32>
    %30 = vector.broadcast %29 : vector<1x256xf32> to vector<8x256xf32>
    %31 = arith.mulf %28, %30 : vector<8x256xf32>
    %32 = vector.extract_strided_slice %2 {offsets = [0, 3], sizes = [8, 1], strides = [1, 1]} : vector<8x9xf32> to vector<8x1xf32>
    %33 = vector.broadcast %32 : vector<8x1xf32> to vector<8x256xf32>
    %34 = arith.mulf %31, %33 : vector<8x256xf32>
    %35 = arith.addf %27, %34 : vector<8x256xf32>
    %36 = vector.extract_strided_slice %0 {offsets = [4, 0], sizes = [1, 256], strides = [1, 1]} : vector<9x256xf32> to vector<1x256xf32>
    %37 = vector.broadcast %36 : vector<1x256xf32> to vector<8x256xf32>
    %38 = arith.mulf %1, %37 : vector<8x256xf32>
    %39 = vector.extract_strided_slice %2 {offsets = [0, 4], sizes = [8, 1], strides = [1, 1]} : vector<8x9xf32> to vector<8x1xf32>
    %40 = vector.broadcast %39 : vector<8x1xf32> to vector<8x256xf32>
    %41 = arith.mulf %38, %40 : vector<8x256xf32>
    %42 = arith.addf %35, %41 : vector<8x256xf32>
    %c255_i32 = arith.constant 255 : i32
    %43 = tpu.dynamic_rotate %1 by %c255_i32 dim 1 : vector<8x256xf32>, i32 -> vector<8x256xf32>
    %44 = vector.extract_strided_slice %0 {offsets = [5, 0], sizes = [1, 256], strides = [1, 1]} : vector<9x256xf32> to vector<1x256xf32>
    %45 = vector.broadcast %44 : vector<1x256xf32> to vector<8x256xf32>
    %46 = arith.mulf %43, %45 : vector<8x256xf32>
    %47 = vector.extract_strided_slice %2 {offsets = [0, 5], sizes = [8, 1], strides = [1, 1]} : vector<8x9xf32> to vector<8x1xf32>
    %48 = vector.broadcast %47 : vector<8x1xf32> to vector<8x256xf32>
    %49 = arith.mulf %46, %48 : vector<8x256xf32>
    %50 = arith.addf %42, %49 : vector<8x256xf32>
    %c241_i32 = arith.constant 241 : i32
    %51 = tpu.dynamic_rotate %1 by %c241_i32 dim 1 : vector<8x256xf32>, i32 -> vector<8x256xf32>
    %52 = vector.extract_strided_slice %0 {offsets = [6, 0], sizes = [1, 256], strides = [1, 1]} : vector<9x256xf32> to vector<1x256xf32>
    %53 = vector.broadcast %52 : vector<1x256xf32> to vector<8x256xf32>
    %54 = arith.mulf %51, %53 : vector<8x256xf32>
    %55 = vector.extract_strided_slice %2 {offsets = [0, 6], sizes = [8, 1], strides = [1, 1]} : vector<8x9xf32> to vector<8x1xf32>
    %56 = vector.broadcast %55 : vector<8x1xf32> to vector<8x256xf32>
    %57 = arith.mulf %54, %56 : vector<8x256xf32>
    %58 = arith.addf %50, %57 : vector<8x256xf32>
    %c240_i32 = arith.constant 240 : i32
    %59 = tpu.dynamic_rotate %1 by %c240_i32 dim 1 : vector<8x256xf32>, i32 -> vector<8x256xf32>
    %60 = vector.extract_strided_slice %0 {offsets = [7, 0], sizes = [1, 256], strides = [1, 1]} : vector<9x256xf32> to vector<1x256xf32>
    %61 = vector.broadcast %60 : vector<1x256xf32> to vector<8x256xf32>
    %62 = arith.mulf %59, %61 : vector<8x256xf32>
    %63 = vector.extract_strided_slice %2 {offsets = [0, 7], sizes = [8, 1], strides = [1, 1]} : vector<8x9xf32> to vector<8x1xf32>
    %64 = vector.broadcast %63 : vector<8x1xf32> to vector<8x256xf32>
    %65 = arith.mulf %62, %64 : vector<8x256xf32>
    %66 = arith.addf %58, %65 : vector<8x256xf32>
    %c239_i32 = arith.constant 239 : i32
    %67 = tpu.dynamic_rotate %1 by %c239_i32 dim 1 : vector<8x256xf32>, i32 -> vector<8x256xf32>
    %68 = vector.extract_strided_slice %0 {offsets = [8, 0], sizes = [1, 256], strides = [1, 1]} : vector<9x256xf32> to vector<1x256xf32>
    %69 = vector.broadcast %68 : vector<1x256xf32> to vector<8x256xf32>
    %70 = arith.mulf %67, %69 : vector<8x256xf32>
    %71 = vector.extract_strided_slice %2 {offsets = [0, 8], sizes = [8, 1], strides = [1, 1]} : vector<8x9xf32> to vector<8x1xf32>
    %72 = vector.broadcast %71 : vector<8x1xf32> to vector<8x256xf32>
    %73 = arith.mulf %70, %72 : vector<8x256xf32>
    %74 = arith.addf %66, %73 : vector<8x256xf32>
    %c0_5 = arith.constant 0 : index
    %c0_6 = arith.constant 0 : index
    %75 = vector.load %arg5[%c0_5, %c0_6] : memref<16x8xf32, #tpu.memory_space<vmem>>, vector<16x8xf32>
    %cst_7 = arith.constant dense<0.000000e+00> : vector<16x256xf32>
    %76 = tpu.matmul %75, %74, %cst_7 {dimension_numbers = #tpu.dot_dimension_numbers<[1], [0], [0], [1], [0, 0, 1, 1], [], []>} : vector<16x8xf32>, vector<8x256xf32>, vector<16x256xf32> -> vector<16x256xf32>
    %c0_8 = arith.constant 0 : index
    %c0_9 = arith.constant 0 : index
    %77 = vector.load %arg6[%c0_8, %c0_9] : memref<16x1xf32, #tpu.memory_space<vmem>>, vector<16x1xf32>
    %78 = vector.broadcast %77 : vector<16x1xf32> to vector<16x256xf32>
    %79 = arith.addf %76, %78 : vector<16x256xf32>
    %cst_10 = arith.constant 0.000000e+00 : f32
    %80 = vector.broadcast %cst_10 : f32 to vector<16x256xf32>
    %81 = arith.maximumf %79, %80 : vector<16x256xf32>
    %c0_11 = arith.constant 0 : index
    %c0_12 = arith.constant 0 : index
    %82 = vector.load %arg7[%c0_11, %c0_12] : memref<16x9xf32, #tpu.memory_space<vmem>>, vector<16x9xf32>
    %cst_13 = arith.constant 0.000000e+00 : f32
    %83 = vector.broadcast %cst_13 : f32 to vector<16x256xf32>
    %c17_i32_14 = arith.constant 17 : i32
    %84 = tpu.dynamic_rotate %81 by %c17_i32_14 dim 1 : vector<16x256xf32>, i32 -> vector<16x256xf32>
    %85 = vector.extract_strided_slice %0 {offsets = [0, 0], sizes = [1, 256], strides = [1, 1]} : vector<9x256xf32> to vector<1x256xf32>
    %86 = vector.broadcast %85 : vector<1x256xf32> to vector<16x256xf32>
    %87 = arith.mulf %84, %86 : vector<16x256xf32>
    %88 = vector.extract_strided_slice %82 {offsets = [0, 0], sizes = [16, 1], strides = [1, 1]} : vector<16x9xf32> to vector<16x1xf32>
    %89 = vector.broadcast %88 : vector<16x1xf32> to vector<16x256xf32>
    %90 = arith.mulf %87, %89 : vector<16x256xf32>
    %91 = arith.addf %83, %90 : vector<16x256xf32>
    %c16_i32_15 = arith.constant 16 : i32
    %92 = tpu.dynamic_rotate %81 by %c16_i32_15 dim 1 : vector<16x256xf32>, i32 -> vector<16x256xf32>
    %93 = vector.extract_strided_slice %0 {offsets = [1, 0], sizes = [1, 256], strides = [1, 1]} : vector<9x256xf32> to vector<1x256xf32>
    %94 = vector.broadcast %93 : vector<1x256xf32> to vector<16x256xf32>
    %95 = arith.mulf %92, %94 : vector<16x256xf32>
    %96 = vector.extract_strided_slice %82 {offsets = [0, 1], sizes = [16, 1], strides = [1, 1]} : vector<16x9xf32> to vector<16x1xf32>
    %97 = vector.broadcast %96 : vector<16x1xf32> to vector<16x256xf32>
    %98 = arith.mulf %95, %97 : vector<16x256xf32>
    %99 = arith.addf %91, %98 : vector<16x256xf32>
    %c15_i32_16 = arith.constant 15 : i32
    %100 = tpu.dynamic_rotate %81 by %c15_i32_16 dim 1 : vector<16x256xf32>, i32 -> vector<16x256xf32>
    %101 = vector.extract_strided_slice %0 {offsets = [2, 0], sizes = [1, 256], strides = [1, 1]} : vector<9x256xf32> to vector<1x256xf32>
    %102 = vector.broadcast %101 : vector<1x256xf32> to vector<16x256xf32>
    %103 = arith.mulf %100, %102 : vector<16x256xf32>
    %104 = vector.extract_strided_slice %82 {offsets = [0, 2], sizes = [16, 1], strides = [1, 1]} : vector<16x9xf32> to vector<16x1xf32>
    %105 = vector.broadcast %104 : vector<16x1xf32> to vector<16x256xf32>
    %106 = arith.mulf %103, %105 : vector<16x256xf32>
    %107 = arith.addf %99, %106 : vector<16x256xf32>
    %c1_i32_17 = arith.constant 1 : i32
    %108 = tpu.dynamic_rotate %81 by %c1_i32_17 dim 1 : vector<16x256xf32>, i32 -> vector<16x256xf32>
    %109 = vector.extract_strided_slice %0 {offsets = [3, 0], sizes = [1, 256], strides = [1, 1]} : vector<9x256xf32> to vector<1x256xf32>
    %110 = vector.broadcast %109 : vector<1x256xf32> to vector<16x256xf32>
    %111 = arith.mulf %108, %110 : vector<16x256xf32>
    %112 = vector.extract_strided_slice %82 {offsets = [0, 3], sizes = [16, 1], strides = [1, 1]} : vector<16x9xf32> to vector<16x1xf32>
    %113 = vector.broadcast %112 : vector<16x1xf32> to vector<16x256xf32>
    %114 = arith.mulf %111, %113 : vector<16x256xf32>
    %115 = arith.addf %107, %114 : vector<16x256xf32>
    %116 = vector.extract_strided_slice %0 {offsets = [4, 0], sizes = [1, 256], strides = [1, 1]} : vector<9x256xf32> to vector<1x256xf32>
    %117 = vector.broadcast %116 : vector<1x256xf32> to vector<16x256xf32>
    %118 = arith.mulf %81, %117 : vector<16x256xf32>
    %119 = vector.extract_strided_slice %82 {offsets = [0, 4], sizes = [16, 1], strides = [1, 1]} : vector<16x9xf32> to vector<16x1xf32>
    %120 = vector.broadcast %119 : vector<16x1xf32> to vector<16x256xf32>
    %121 = arith.mulf %118, %120 : vector<16x256xf32>
    %122 = arith.addf %115, %121 : vector<16x256xf32>
    %c255_i32_18 = arith.constant 255 : i32
    %123 = tpu.dynamic_rotate %81 by %c255_i32_18 dim 1 : vector<16x256xf32>, i32 -> vector<16x256xf32>
    %124 = vector.extract_strided_slice %0 {offsets = [5, 0], sizes = [1, 256], strides = [1, 1]} : vector<9x256xf32> to vector<1x256xf32>
    %125 = vector.broadcast %124 : vector<1x256xf32> to vector<16x256xf32>
    %126 = arith.mulf %123, %125 : vector<16x256xf32>
    %127 = vector.extract_strided_slice %82 {offsets = [0, 5], sizes = [16, 1], strides = [1, 1]} : vector<16x9xf32> to vector<16x1xf32>
    %128 = vector.broadcast %127 : vector<16x1xf32> to vector<16x256xf32>
    %129 = arith.mulf %126, %128 : vector<16x256xf32>
    %130 = arith.addf %122, %129 : vector<16x256xf32>
    %c241_i32_19 = arith.constant 241 : i32
    %131 = tpu.dynamic_rotate %81 by %c241_i32_19 dim 1 : vector<16x256xf32>, i32 -> vector<16x256xf32>
    %132 = vector.extract_strided_slice %0 {offsets = [6, 0], sizes = [1, 256], strides = [1, 1]} : vector<9x256xf32> to vector<1x256xf32>
    %133 = vector.broadcast %132 : vector<1x256xf32> to vector<16x256xf32>
    %134 = arith.mulf %131, %133 : vector<16x256xf32>
    %135 = vector.extract_strided_slice %82 {offsets = [0, 6], sizes = [16, 1], strides = [1, 1]} : vector<16x9xf32> to vector<16x1xf32>
    %136 = vector.broadcast %135 : vector<16x1xf32> to vector<16x256xf32>
    %137 = arith.mulf %134, %136 : vector<16x256xf32>
    %138 = arith.addf %130, %137 : vector<16x256xf32>
    %c240_i32_20 = arith.constant 240 : i32
    %139 = tpu.dynamic_rotate %81 by %c240_i32_20 dim 1 : vector<16x256xf32>, i32 -> vector<16x256xf32>
    %140 = vector.extract_strided_slice %0 {offsets = [7, 0], sizes = [1, 256], strides = [1, 1]} : vector<9x256xf32> to vector<1x256xf32>
    %141 = vector.broadcast %140 : vector<1x256xf32> to vector<16x256xf32>
    %142 = arith.mulf %139, %141 : vector<16x256xf32>
    %143 = vector.extract_strided_slice %82 {offsets = [0, 7], sizes = [16, 1], strides = [1, 1]} : vector<16x9xf32> to vector<16x1xf32>
    %144 = vector.broadcast %143 : vector<16x1xf32> to vector<16x256xf32>
    %145 = arith.mulf %142, %144 : vector<16x256xf32>
    %146 = arith.addf %138, %145 : vector<16x256xf32>
    %c239_i32_21 = arith.constant 239 : i32
    %147 = tpu.dynamic_rotate %81 by %c239_i32_21 dim 1 : vector<16x256xf32>, i32 -> vector<16x256xf32>
    %148 = vector.extract_strided_slice %0 {offsets = [8, 0], sizes = [1, 256], strides = [1, 1]} : vector<9x256xf32> to vector<1x256xf32>
    %149 = vector.broadcast %148 : vector<1x256xf32> to vector<16x256xf32>
    %150 = arith.mulf %147, %149 : vector<16x256xf32>
    %151 = vector.extract_strided_slice %82 {offsets = [0, 8], sizes = [16, 1], strides = [1, 1]} : vector<16x9xf32> to vector<16x1xf32>
    %152 = vector.broadcast %151 : vector<16x1xf32> to vector<16x256xf32>
    %153 = arith.mulf %150, %152 : vector<16x256xf32>
    %154 = arith.addf %146, %153 : vector<16x256xf32>
    %c0_22 = arith.constant 0 : index
    %c0_23 = arith.constant 0 : index
    %155 = vector.load %arg8[%c0_22, %c0_23] : memref<16x16xf32, #tpu.memory_space<vmem>>, vector<16x16xf32>
    %cst_24 = arith.constant dense<0.000000e+00> : vector<16x256xf32>
    %156 = tpu.matmul %155, %154, %cst_24 {dimension_numbers = #tpu.dot_dimension_numbers<[1], [0], [0], [1], [0, 0, 1, 1], [], []>} : vector<16x16xf32>, vector<16x256xf32>, vector<16x256xf32> -> vector<16x256xf32>
    %c0_25 = arith.constant 0 : index
    %c0_26 = arith.constant 0 : index
    %157 = vector.load %arg9[%c0_25, %c0_26] : memref<16x1xf32, #tpu.memory_space<vmem>>, vector<16x1xf32>
    %158 = vector.broadcast %157 : vector<16x1xf32> to vector<16x256xf32>
    %159 = arith.addf %156, %158 : vector<16x256xf32>
    %cst_27 = arith.constant 0.000000e+00 : f32
    %160 = vector.broadcast %cst_27 : f32 to vector<16x256xf32>
    %161 = arith.maximumf %159, %160 : vector<16x256xf32>
    %cst_28 = arith.constant dense<0.000000e+00> : vector<16xf32>
    %162 = vector.multi_reduction <add>, %161, %cst_28 [1] : vector<16x256xf32> to vector<16xf32>
    %163 = vector.shape_cast %162 : vector<16xf32> to vector<16x1xf32>
    %cst_29 = arith.constant 2.560000e+02 : f32
    %164 = vector.broadcast %cst_29 : f32 to vector<16x1xf32>
    %165 = arith.divf %163, %164 : vector<16x1xf32>
    %166 = vector.broadcast %165 : vector<16x1xf32> to vector<16x256xf32>
    %167 = arith.subf %161, %166 : vector<16x256xf32>
    %168 = arith.mulf %167, %167 : vector<16x256xf32>
    %cst_30 = arith.constant dense<0.000000e+00> : vector<16xf32>
    %169 = vector.multi_reduction <add>, %168, %cst_30 [1] : vector<16x256xf32> to vector<16xf32>
    %170 = vector.shape_cast %169 : vector<16xf32> to vector<16x1xf32>
    %cst_31 = arith.constant 2.560000e+02 : f32
    %171 = vector.broadcast %cst_31 : f32 to vector<16x1xf32>
    %172 = arith.divf %170, %171 : vector<16x1xf32>
    %173 = vector.broadcast %165 : vector<16x1xf32> to vector<16x256xf32>
    %174 = arith.subf %161, %173 : vector<16x256xf32>
    %cst_32 = arith.constant 1.000000e-03 : f32
    %175 = vector.broadcast %cst_32 : f32 to vector<16x1xf32>
    %176 = arith.addf %172, %175 : vector<16x1xf32>
    %177 = math.rsqrt %176 : vector<16x1xf32>
    %178 = vector.broadcast %177 : vector<16x1xf32> to vector<16x256xf32>
    %179 = arith.mulf %174, %178 : vector<16x256xf32>
    %c0_33 = arith.constant 0 : index
    %c0_34 = arith.constant 0 : index
    %180 = vector.load %arg10[%c0_33, %c0_34] : memref<16x9xf32, #tpu.memory_space<vmem>>, vector<16x9xf32>
    %cst_35 = arith.constant 0.000000e+00 : f32
    %181 = vector.broadcast %cst_35 : f32 to vector<16x256xf32>
    %c17_i32_36 = arith.constant 17 : i32
    %182 = tpu.dynamic_rotate %179 by %c17_i32_36 dim 1 : vector<16x256xf32>, i32 -> vector<16x256xf32>
    %183 = vector.extract_strided_slice %0 {offsets = [0, 0], sizes = [1, 256], strides = [1, 1]} : vector<9x256xf32> to vector<1x256xf32>
    %184 = vector.broadcast %183 : vector<1x256xf32> to vector<16x256xf32>
    %185 = arith.mulf %182, %184 : vector<16x256xf32>
    %186 = vector.extract_strided_slice %180 {offsets = [0, 0], sizes = [16, 1], strides = [1, 1]} : vector<16x9xf32> to vector<16x1xf32>
    %187 = vector.broadcast %186 : vector<16x1xf32> to vector<16x256xf32>
    %188 = arith.mulf %185, %187 : vector<16x256xf32>
    %189 = arith.addf %181, %188 : vector<16x256xf32>
    %c16_i32_37 = arith.constant 16 : i32
    %190 = tpu.dynamic_rotate %179 by %c16_i32_37 dim 1 : vector<16x256xf32>, i32 -> vector<16x256xf32>
    %191 = vector.extract_strided_slice %0 {offsets = [1, 0], sizes = [1, 256], strides = [1, 1]} : vector<9x256xf32> to vector<1x256xf32>
    %192 = vector.broadcast %191 : vector<1x256xf32> to vector<16x256xf32>
    %193 = arith.mulf %190, %192 : vector<16x256xf32>
    %194 = vector.extract_strided_slice %180 {offsets = [0, 1], sizes = [16, 1], strides = [1, 1]} : vector<16x9xf32> to vector<16x1xf32>
    %195 = vector.broadcast %194 : vector<16x1xf32> to vector<16x256xf32>
    %196 = arith.mulf %193, %195 : vector<16x256xf32>
    %197 = arith.addf %189, %196 : vector<16x256xf32>
    %c15_i32_38 = arith.constant 15 : i32
    %198 = tpu.dynamic_rotate %179 by %c15_i32_38 dim 1 : vector<16x256xf32>, i32 -> vector<16x256xf32>
    %199 = vector.extract_strided_slice %0 {offsets = [2, 0], sizes = [1, 256], strides = [1, 1]} : vector<9x256xf32> to vector<1x256xf32>
    %200 = vector.broadcast %199 : vector<1x256xf32> to vector<16x256xf32>
    %201 = arith.mulf %198, %200 : vector<16x256xf32>
    %202 = vector.extract_strided_slice %180 {offsets = [0, 2], sizes = [16, 1], strides = [1, 1]} : vector<16x9xf32> to vector<16x1xf32>
    %203 = vector.broadcast %202 : vector<16x1xf32> to vector<16x256xf32>
    %204 = arith.mulf %201, %203 : vector<16x256xf32>
    %205 = arith.addf %197, %204 : vector<16x256xf32>
    %c1_i32_39 = arith.constant 1 : i32
    %206 = tpu.dynamic_rotate %179 by %c1_i32_39 dim 1 : vector<16x256xf32>, i32 -> vector<16x256xf32>
    %207 = vector.extract_strided_slice %0 {offsets = [3, 0], sizes = [1, 256], strides = [1, 1]} : vector<9x256xf32> to vector<1x256xf32>
    %208 = vector.broadcast %207 : vector<1x256xf32> to vector<16x256xf32>
    %209 = arith.mulf %206, %208 : vector<16x256xf32>
    %210 = vector.extract_strided_slice %180 {offsets = [0, 3], sizes = [16, 1], strides = [1, 1]} : vector<16x9xf32> to vector<16x1xf32>
    %211 = vector.broadcast %210 : vector<16x1xf32> to vector<16x256xf32>
    %212 = arith.mulf %209, %211 : vector<16x256xf32>
    %213 = arith.addf %205, %212 : vector<16x256xf32>
    %214 = vector.extract_strided_slice %0 {offsets = [4, 0], sizes = [1, 256], strides = [1, 1]} : vector<9x256xf32> to vector<1x256xf32>
    %215 = vector.broadcast %214 : vector<1x256xf32> to vector<16x256xf32>
    %216 = arith.mulf %179, %215 : vector<16x256xf32>
    %217 = vector.extract_strided_slice %180 {offsets = [0, 4], sizes = [16, 1], strides = [1, 1]} : vector<16x9xf32> to vector<16x1xf32>
    %218 = vector.broadcast %217 : vector<16x1xf32> to vector<16x256xf32>
    %219 = arith.mulf %216, %218 : vector<16x256xf32>
    %220 = arith.addf %213, %219 : vector<16x256xf32>
    %c255_i32_40 = arith.constant 255 : i32
    %221 = tpu.dynamic_rotate %179 by %c255_i32_40 dim 1 : vector<16x256xf32>, i32 -> vector<16x256xf32>
    %222 = vector.extract_strided_slice %0 {offsets = [5, 0], sizes = [1, 256], strides = [1, 1]} : vector<9x256xf32> to vector<1x256xf32>
    %223 = vector.broadcast %222 : vector<1x256xf32> to vector<16x256xf32>
    %224 = arith.mulf %221, %223 : vector<16x256xf32>
    %225 = vector.extract_strided_slice %180 {offsets = [0, 5], sizes = [16, 1], strides = [1, 1]} : vector<16x9xf32> to vector<16x1xf32>
    %226 = vector.broadcast %225 : vector<16x1xf32> to vector<16x256xf32>
    %227 = arith.mulf %224, %226 : vector<16x256xf32>
    %228 = arith.addf %220, %227 : vector<16x256xf32>
    %c241_i32_41 = arith.constant 241 : i32
    %229 = tpu.dynamic_rotate %179 by %c241_i32_41 dim 1 : vector<16x256xf32>, i32 -> vector<16x256xf32>
    %230 = vector.extract_strided_slice %0 {offsets = [6, 0], sizes = [1, 256], strides = [1, 1]} : vector<9x256xf32> to vector<1x256xf32>
    %231 = vector.broadcast %230 : vector<1x256xf32> to vector<16x256xf32>
    %232 = arith.mulf %229, %231 : vector<16x256xf32>
    %233 = vector.extract_strided_slice %180 {offsets = [0, 6], sizes = [16, 1], strides = [1, 1]} : vector<16x9xf32> to vector<16x1xf32>
    %234 = vector.broadcast %233 : vector<16x1xf32> to vector<16x256xf32>
    %235 = arith.mulf %232, %234 : vector<16x256xf32>
    %236 = arith.addf %228, %235 : vector<16x256xf32>
    %c240_i32_42 = arith.constant 240 : i32
    %237 = tpu.dynamic_rotate %179 by %c240_i32_42 dim 1 : vector<16x256xf32>, i32 -> vector<16x256xf32>
    %238 = vector.extract_strided_slice %0 {offsets = [7, 0], sizes = [1, 256], strides = [1, 1]} : vector<9x256xf32> to vector<1x256xf32>
    %239 = vector.broadcast %238 : vector<1x256xf32> to vector<16x256xf32>
    %240 = arith.mulf %237, %239 : vector<16x256xf32>
    %241 = vector.extract_strided_slice %180 {offsets = [0, 7], sizes = [16, 1], strides = [1, 1]} : vector<16x9xf32> to vector<16x1xf32>
    %242 = vector.broadcast %241 : vector<16x1xf32> to vector<16x256xf32>
    %243 = arith.mulf %240, %242 : vector<16x256xf32>
    %244 = arith.addf %236, %243 : vector<16x256xf32>
    %c239_i32_43 = arith.constant 239 : i32
    %245 = tpu.dynamic_rotate %179 by %c239_i32_43 dim 1 : vector<16x256xf32>, i32 -> vector<16x256xf32>
    %246 = vector.extract_strided_slice %0 {offsets = [8, 0], sizes = [1, 256], strides = [1, 1]} : vector<9x256xf32> to vector<1x256xf32>
    %247 = vector.broadcast %246 : vector<1x256xf32> to vector<16x256xf32>
    %248 = arith.mulf %245, %247 : vector<16x256xf32>
    %249 = vector.extract_strided_slice %180 {offsets = [0, 8], sizes = [16, 1], strides = [1, 1]} : vector<16x9xf32> to vector<16x1xf32>
    %250 = vector.broadcast %249 : vector<16x1xf32> to vector<16x256xf32>
    %251 = arith.mulf %248, %250 : vector<16x256xf32>
    %252 = arith.addf %244, %251 : vector<16x256xf32>
    %c0_44 = arith.constant 0 : index
    %c0_45 = arith.constant 0 : index
    %253 = vector.load %arg3[%c0_44, %c0_45] : memref<256x128xf32, #tpu.memory_space<vmem>>, vector<256x128xf32>
    %cst_46 = arith.constant dense<0.000000e+00> : vector<16x128xf32>
    %254 = tpu.matmul %252, %253, %cst_46 {dimension_numbers = #tpu.dot_dimension_numbers<[1], [0], [0], [1], [0, 0, 1, 1], [], []>} : vector<16x256xf32>, vector<256x128xf32>, vector<16x128xf32> -> vector<16x128xf32>
    %c0_47 = arith.constant 0 : index
    %c0_48 = arith.constant 0 : index
    %255 = vector.load %arg11[%c0_47, %c0_48] : memref<16x16xf32, #tpu.memory_space<vmem>>, vector<16x16xf32>
    %cst_49 = arith.constant dense<0.000000e+00> : vector<16x128xf32>
    %256 = tpu.matmul %255, %254, %cst_49 {dimension_numbers = #tpu.dot_dimension_numbers<[1], [0], [0], [1], [0, 0, 1, 1], [], []>} : vector<16x16xf32>, vector<16x128xf32>, vector<16x128xf32> -> vector<16x128xf32>
    %c0_50 = arith.constant 0 : index
    %c0_51 = arith.constant 0 : index
    %257 = vector.load %arg12[%c0_50, %c0_51] : memref<16x1xf32, #tpu.memory_space<vmem>>, vector<16x1xf32>
    %258 = vector.broadcast %257 : vector<16x1xf32> to vector<16x128xf32>
    %259 = arith.addf %256, %258 : vector<16x128xf32>
    %c0_52 = arith.constant 0 : index
    %c0_53 = arith.constant 0 : index
    %260 = vector.load %arg13[%c0_52, %c0_53] : memref<16x128xf32, #tpu.memory_space<vmem>>, vector<16x128xf32>
    tpu.vector_store %arg13[%c0_52, %c0_53], %259 {strides = array<i32>} : memref<16x128xf32, #tpu.memory_space<vmem>>, vector<16x128xf32>,
    return
  }
  func.func @transform_0(%arg0: i32) -> (i32, i32) {
    %c0_i32 = arith.constant 0 : i32
    %c0_i32_0 = arith.constant 0 : i32
    return %arg0, %c0_i32 : i32, i32
  }
  func.func @transform_1(%arg0: i32) -> (i32, i32) {
    %c0_i32 = arith.constant 0 : i32
    %c0_i32_0 = arith.constant 0 : i32
    %c0_i32_1 = arith.constant 0 : i32
    return %c0_i32, %c0_i32_0 : i32, i32
  }
  func.func @transform_2(%arg0: i32) -> (i32, i32) {
    %c0_i32 = arith.constant 0 : i32
    %c0_i32_0 = arith.constant 0 : i32
    %c0_i32_1 = arith.constant 0 : i32
    return %c0_i32, %c0_i32_0 : i32, i32
  }
  func.func @transform_3(%arg0: i32) -> (i32, i32) {
    %c0_i32 = arith.constant 0 : i32
    %c0_i32_0 = arith.constant 0 : i32
    %c0_i32_1 = arith.constant 0 : i32
    return %c0_i32, %c0_i32_0 : i32, i32
  }
  func.func @transform_4(%arg0: i32) -> (i32, i32) {
    %c0_i32 = arith.constant 0 : i32
    %c0_i32_0 = arith.constant 0 : i32
    %c0_i32_1 = arith.constant 0 : i32
    return %c0_i32, %c0_i32_0 : i32, i32
  }
  func.func @transform_5(%arg0: i32) -> (i32, i32) {
    %c0_i32 = arith.constant 0 : i32
    %c0_i32_0 = arith.constant 0 : i32
    %c0_i32_1 = arith.constant 0 : i32
    return %c0_i32, %c0_i32_0 : i32, i32
  }
  func.func @transform_6(%arg0: i32) -> (i32, i32) {
    %c0_i32 = arith.constant 0 : i32
    %c0_i32_0 = arith.constant 0 : i32
    %c0_i32_1 = arith.constant 0 : i32
    return %c0_i32, %c0_i32_0 : i32, i32
  }
  func.func @transform_7(%arg0: i32) -> (i32, i32) {
    %c0_i32 = arith.constant 0 : i32
    %c0_i32_0 = arith.constant 0 : i32
    %c0_i32_1 = arith.constant 0 : i32
    return %c0_i32, %c0_i32_0 : i32, i32
  }
  func.func @transform_8(%arg0: i32) -> (i32, i32) {
    %c0_i32 = arith.constant 0 : i32
    %c0_i32_0 = arith.constant 0 : i32
    %c0_i32_1 = arith.constant 0 : i32
    return %c0_i32, %c0_i32_0 : i32, i32
  }
  func.func @transform_9(%arg0: i32) -> (i32, i32) {
    %c0_i32 = arith.constant 0 : i32
    %c0_i32_0 = arith.constant 0 : i32
    %c0_i32_1 = arith.constant 0 : i32
    return %c0_i32, %c0_i32_0 : i32, i32
  }
  func.func @transform_10(%arg0: i32) -> (i32, i32) {
    %c0_i32 = arith.constant 0 : i32
    %c0_i32_0 = arith.constant 0 : i32
    %c0_i32_1 = arith.constant 0 : i32
    return %c0_i32, %c0_i32_0 : i32, i32
  }
  func.func @transform_11(%arg0: i32) -> (i32, i32) {
    %c0_i32 = arith.constant 0 : i32
    %c0_i32_0 = arith.constant 0 : i32
    %c0_i32_1 = arith.constant 0 : i32
    return %c0_i32, %c0_i32_0 : i32, i32
  }
  func.func @transform_12(%arg0: i32) -> (i32, i32) {
    %c0_i32 = arith.constant 0 : i32
    %c0_i32_0 = arith.constant 0 : i32
    return %arg0, %c0_i32 : i32, i32
  }
}

</mosaic_0001>

<bundles_post_ra>
// kernel: tpu_custom_call.1
= control target key start
LH: loop header
LB: loop body
LE: loop exit
PB: predicated region body
PF: predicated region fallthrough
CT: control target
= control target key end

     0   :  { %17 = vsyncpa [#allocation3], 0  ;;  %s2398_s0 = inlined_call_operand.vmem [shape: f32[8,256], index: 0, kind: input, shape index: {}]   ;;  %s2399_s1 = inlined_call_operand.vmem [shape: f32[9,256], index: 1, kind: input, shape index: {}]   ;;  %s2400_s2 = inlined_call_operand.hbm [shape: f32[256,128], index: 2, kind: input, shape index: {}]   ;;  %s2401_s3 = inlined_call_operand.hbm [shape: f32[8,9], index: 3, kind: input, shape index: {}]   ;;  %s2402_s4 = inlined_call_operand.vmem [shape: f32[16,8], index: 4, kind: input, shape index: {}]   ;;  %s2403_s5 = inlined_call_operand.vmem [shape: f32[16,1], index: 5, kind: input, shape index: {}]   ;;  %s2404_s6 = inlined_call_operand.vmem [shape: f32[16,9], index: 6, kind: input, shape index: {}]   ;;  %s2405_s7 = inlined_call_operand.hbm [shape: f32[16,16], index: 7, kind: input, shape index: {}]   ;;  %s2406_s8 = inlined_call_operand.vmem [shape: f32[16,1], index: 8, kind: input, shape index: {}]   ;;  %s2407_s9 = inlined_call_operand.hbm [shape: f32[16,9], index: 9, kind: input, shape index: {}]   ;;  %s2408_s10 = inlined_call_operand.vmem [shape: f32[16,16], index: 10, kind: input, shape index: {}]   ;;  %s2409_s11 = inlined_call_operand.vmem [shape: f32[16,1], index: 11, kind: input, shape index: {}]   ;;  %s2410_s12 = inlined_call_operand.hbm [shape: f32[16,128], index: 12, kind: output, shape index: {}]  }
   0x1   :  { %18 = vsyncpa [#allocation6], 0 }
   0x2   :  { %19 = vsyncpa [#allocation9], 0  ;;  %s43_s23 = sshll.u32 %s2401_s3, 4  ;;  %s44_s23 = int_to_ptr.hbm [resolvable:$true] %s43_s23 }
   0x3   :  { %20 = vsyncpa [#allocation4], 0  ;;  %s1406_s24 = smov [#allocation5]   ;;  %s29_s28 = sshll.u32 %s2400_s2, 4  ;;  %s30_s28 = int_to_ptr.hbm [resolvable:$true] %s29_s28 }
   0x4   :  { %s45_s25 = sshll.u32 %s1406_s24, 4  ;;  %s1407_s29 = smov [#allocation2]   ;;  %s46_s25 = int_to_ptr.vmem [resolvable:$true] %s45_s25 }
   0x5   :  { %48 = dma.hbm_to_vmem [thread:$0]  %s44_s23, 128, %s46_s25, [#allocation6]  }
   0x6   :  { %s31_s30 = sshll.u32 %s1407_s29, 4  ;;  %s1408_s13 = smov 128   ;;  %s32_s30 = int_to_ptr.vmem [resolvable:$true] %s31_s30 }
   0x7   :  { %s1409_s14 = smov 8   ;;  %s59_s16 = sshll.u32 %s2405_s7, 4  ;;  %s60_s16 = int_to_ptr.hbm [resolvable:$true] %s59_s16 }
   0x8   :  { %37 = dma.hbm_to_vmem [thread:$0]  %s30_s28, 4096, %s32_s30, [#allocation3], %s1408_s13, %s1408_s13, %s1409_s14  }
   0x9   :  { %s1410_s17 = smov [#allocation7]   ;;  %s74_s20 = sshll.u32 %s2407_s9, 4  ;;  %s75_s20 = int_to_ptr.hbm [resolvable:$true] %s74_s20 }
   0xa   :  { %s61_s18 = sshll.u32 %s1410_s17, 4  ;;  %s1411_s21 = smov [#allocation8]   ;;  %s62_s18 = int_to_ptr.vmem [resolvable:$true] %s61_s18 }
   0xb   :  { %67 = dma.hbm_to_vmem [thread:$0]  %s60_s16, 256, %s62_s18, [#allocation6], %s1408_s13, %s1408_s13, %s1409_s14  }
   0xc   :  { %s76_s22 = sshll.u32 %s1411_s21, 4  ;;  %s77_s22 = int_to_ptr.vmem [resolvable:$true] %s76_s22 }
   0xd   :  { %82 = dma.hbm_to_vmem [thread:$0]  %s75_s20, 256, %s77_s22, [#allocation9], %s1408_s13, %s1408_s13, %s1409_s14  }
   0xe   :  { %1398 = dma.done.wait [#allocation3], 4096  }
   0xf   :  { %1399 = vsyncadd [#allocation3], 4294963200 }
  0x10   :  { %1400 = dma.done.wait [#allocation6], 384  }
  0x11   :  { %1401 = vsyncadd [#allocation6], 4294966912 }
  0x12   :  { %1402 = dma.done.wait [#allocation9], 256  }
  0x13   :  { %1403 = vsyncadd [#allocation9], 4294967040  ;;  %v2419_v0 = vmov 3   ;;  %v2422_v1 = vmov 1   ;;  %v2420_v2 = vmov 2   ;;  %v1523_v3 = vld [vmem:[%s2398_s0] sm:$0xff]  ;;  %v114_v27 = vlaneseq }
  0x14   :  { %1233 = vset.pattern.permute.xlu0 %v2419_v0  ;;  %1231 = vset.pattern.permute.xlu1 %v2422_v1  ;;  %s1415_s23 = smov 16   ;;  %s1416_s24 = smov 17   ;;  %v1534_v4 = vld [vmem:[%s2398_s0 + $0x8] sm:$0xff]  ;;  %v109_v5 = vld [vmem:[#allocation5] sm:$0xff]  ;;  %v2411_v6 = vmov 0   ;;  %v2421_v7 = vmov 4  }
  0x15   :  { %1232 = vset.pattern.permute.xlu2 %v2420_v2  ;;  %132 = vrot.lane.b32.xlu1 %v1523_v3, %s1415_s23  ;;  %s1417_s25 = smov 15   ;;  %s1418_s28 = smov 1   ;;  %v2413_v8 = vmov 8   ;;  %v2417_v9 = vmov 5   ;;  %v280_v10 = vld [vmem:[%s2403_s5 + $0x8] sm:$0xff]  ;;  %v2415_v11 = vmov 6  }
  0x16   :  { %110 = vrot.lane.b32.xlu0 %v1523_v3, %s1416_s24  ;;  %151 = vrot.lane.b32.xlu2 %v1523_v3, %s1417_s25  ;;  %s1421_s0 = smov 127   ;;  %s1422_s29 = smov 113   ;;  %v2416_v12 = vmov 7   ;;  %v279_v28 = vld [vmem:[%s2403_s5] sm:$0xff]  ;;  %v1585_v29 = vand.u32 127, %v114_v27  ;;  %v1605_v34 = vld [vmem:[%s2399_s1 + $0x8] sm:$0xff] }
  0x17   :  { %s1424_s30 = smov 112   ;;  %s1426_s3 = smov 111   ;;  %v1593_v31 = vld [vmem:[%s2399_s1] sm:$0xff]  ;;  %v1612_v37 = vld [vmem:[%s2404_s6 + $0x8] sm:$0xff]  ;;  %v1618_v39 = vperm.slane %v1605_v34, 0  ;;  %v1632_v44 = vperm.slane %v1605_v34, 1 }
  0x18   :  { %vm116_vm0 = vcmp.lt.s32.totalorder %v1585_v29, 17  ;;  %vm136_vm1 = vcmp.lt.s32.totalorder %v1585_v29, 16  ;;  %v1599_v33 = vperm.slane %v1593_v31, 0  ;;  %vm155_vm2 = vcmp.lt.s32.totalorder %v1585_v29, 15  ;;  %s1165_s26 = sshll.u32 %s2410_s12, 4  ;;  %s1166_s26 = int_to_ptr.hbm [resolvable:$true] %s1165_s26 }
  0x19   :  { %v1615_v38 = vperm.slane %v1593_v31, 1  ;;  %v1622_v40 = vperm.slane %v1593_v31, 2  ;;  %v1637_v46 = vperm.slane %v1605_v34, 2  ;;  %vm174_vm3 = vcmp.lt.s32.totalorder %v1585_v29, 1 }
  0x1a   :  { %v1651_v56 = vperm.slane %v1593_v31, 3  ;;  %v1657_v62 = vperm.slane %v1605_v34, 3  ;;  %vm205_vm4 = vcmp.lt.s32.totalorder %v1585_v29, 127  ;;  %vm224_vm5 = vcmp.lt.s32.totalorder %v1585_v29, 113 }
  0x1b   :  { %vm243_vm6 = vcmp.lt.s32.totalorder %v1585_v29, 112  ;;  %vm262_vm7 = vcmp.lt.s32.totalorder %v1585_v29, 111  ;;  %vm291_vm8 = vcmask 64512   ;;  %vm642_vm9 = vcmask 130048  }
  0x1d   :  { %134 = vrot.lane.b32.xlu1 %v1534_v4, %s1415_s23 }
  0x1e   :  { %112 = vrot.lane.b32.xlu0 %v1534_v4, %s1416_s24  ;;  %153 = vrot.lane.b32.xlu2 %v1534_v4, %s1417_s25 }
  0x25   :  { %144 = vperm.xlu1 %1231, %v109_v5  }
  0x26   :  { %182 = vperm.xlu0 %1233, %v109_v5   ;;  %170 = vrot.lane.b32.xlu2 %v1523_v3, %s1418_s28 }
  0x2d   :  { %172 = vrot.lane.b32.xlu1 %v1534_v4, %s1418_s28 }
  0x2e   :  { %1234 = vset.pattern.permute.xlu0 %v2411_v6  ;;  %163 = vperm.xlu2 %1232, %v109_v5  }
  0x2f   :  { %125 = vperm.xlu0 %1234, %v109_v5   ;;  %1235 = vset.pattern.permute.xlu1 %v2421_v7 }
  0x35   :  { %201 = vrot.lane.b32.xlu1 %v1523_v3, %s1421_s0 }
  0x36   :  { %203 = vrot.lane.b32.xlu2 %v1534_v4, %s1421_s0 }
  0x37   :  { %222 = vrot.lane.b32.xlu0 %v1534_v4, %s1422_s29  ;;  %1239 = vset.pattern.permute.xlu2 %v2413_v8 }
  0x3d   :  { %194 = vperm.xlu1 %1235, %v109_v5  }
  0x3e   :  { %220 = vrot.lane.b32.xlu2 %v1523_v3, %s1422_s29 }
  0x3f   :  { %241 = vrot.lane.b32.xlu0 %v1534_v4, %s1424_s30 }
  0x45   :  { %1236 = vset.pattern.permute.xlu1 %v2417_v9 }
  0x46   :  { %213 = vperm.xlu1 %1236, %v109_v5   ;;  %239 = vrot.lane.b32.xlu2 %v1523_v3, %s1424_s30 }
  0x47   :  { %260 = vrot.lane.b32.xlu0 %v1534_v4, %s1426_s3 }
  0x4e   :  { %1237 = vset.pattern.permute.xlu1 %v2415_v11  ;;  %258 = vrot.lane.b32.xlu2 %v1523_v3, %s1426_s3 }
  0x4f   :  { %288 = vperm.xlu0 %1234, %v280_v10   ;;  %232 = vperm.xlu1 %1237, %v109_v5  }
  0x56   :  { %270 = vperm.xlu2 %1239, %v109_v5  }
  0x57   :  { %1242 = vset.pattern.permute.xlu0 %v2420_v2  ;;  %1238 = vset.pattern.permute.xlu1 %v2416_v12 }
  0x58   :  { %251 = vperm.xlu1 %1238, %v109_v5   ;;  %437 = vperm.xlu0 %1242, %v1612_v37   ;;  %v1663_v5 = vld [vmem:[%s2404_s6] sm:$0xff] }
  0x5e   :  { %1241 = vset.pattern.permute.xlu2 %v2422_v1 }
  0x5f   :  { %405 = vperm.xlu2 %1241, %v1612_v37  }
  0x60   :  { %1240 = vset.pattern.permute.xlu1 %v2411_v6  ;;  %1245 = vset.pattern.permute.xlu0 %v2421_v7 }
  0x61   :  { %283 = vperm.xlu1 %1240, %v279_v28   ;;  %489 = vperm.xlu0 %1245, %v1612_v37  }
  0x67   :  { %401 = vperm.xlu2 %1241, %v1663_v5  }
  0x69   :  { %373 = vperm.xlu1 %1240, %v1612_v37   ;;  %485 = vperm.xlu0 %1245, %v1663_v5  }
  0x6f   :  { %1244 = vset.pattern.permute.xlu2 %v2419_v0 }
  0x70   :  { %v152_v13 = vpop.permute.xlu2 %151  ;;  %469 = vperm.xlu2 %1244, %v1612_v37  }
  0x71   :  { %368 = vperm.xlu1 %1240, %v1663_v5   ;;  %1247 = vset.pattern.permute.xlu0 %v2417_v9 }
  0x72   :  { %517 = vperm.xlu0 %1247, %v1663_v5  }
  0x78   :  { %v154_v14 = vpop.permute.xlu2 %153  ;;  %465 = vperm.xlu2 %1244, %v1663_v5  }
  0x79   :  { %v157_v43 = vsel %vm155_vm2, %v154_v14, %v152_v13  ;;  %v156_v52 = vsel %vm155_vm2, %v152_v13, %v154_v14  ;;  %v1668_v13 = vperm.slane %v1593_v31, 4  ;;  %v1671_v14 = vperm.slane %v1605_v34, 4  ;;  %1243 = vset.pattern.permute.xlu1 %v2420_v2 }
  0x7a   :  { %v160_v53 = vmul.f32 %v1622_v40, %v157_v43  ;;  %v161_v60 = vmul.f32 %v1637_v46, %v156_v52  ;;  %433 = vperm.xlu1 %1243, %v1663_v5   ;;  %1250 = vset.pattern.permute.xlu0 %v2413_v8 }
  0x80   :  { %v171_v18 = vpop.permute.xlu2 %170  ;;  %1249 = vset.pattern.permute.xlu2 %v2416_v12 }
  0x81   :  { %585 = vperm.xlu2 %1249, %v1612_v37  }
  0x82   :  { %1246 = vset.pattern.permute.xlu1 %v2417_v9 }
  0x83   :  { %521 = vperm.xlu1 %1246, %v1612_v37  }
  0x87   :  { %v133_v15 = vpop.permute.xlu1 %132 }
  0x88   :  { %v111_v16 = vpop.permute.xlu0 %110  ;;  %v1574_v21 = vpop.permute.xlu2 %163 }
  0x8b   :  { %1248 = vset.pattern.permute.xlu1 %v2415_v11 }
  0x8c   :  { %553 = vperm.xlu1 %1248, %v1612_v37  }
  0x8f   :  { %v135_v17 = vpop.permute.xlu1 %134 }
  0x90   :  { %v113_v19 = vpop.permute.xlu0 %112  ;;  %v1578_v24 = vpop.permute.xlu2 %203  ;;  %v138_v41 = vsel %vm136_vm1, %v135_v17, %v133_v15  ;;  %v137_v47 = vsel %vm136_vm1, %v133_v15, %v135_v17 }
  0x91   :  { %v118_v35 = vsel %vm116_vm0, %v113_v19, %v111_v16  ;;  %v117_v42 = vsel %vm116_vm0, %v111_v16, %v113_v19  ;;  %v141_v48 = vmul.f32 %v1615_v38, %v138_v41  ;;  %v142_v54 = vmul.f32 %v1632_v44, %v137_v47 }
  0x92   :  { %v121_v45 = vmul.f32 %v1599_v33, %v118_v35  ;;  %v122_v49 = vmul.f32 %v1618_v39, %v117_v42  ;;  %v166_v16 = vmul.f32 %v1574_v21, %v160_v53  ;;  %v1693_v35 = vperm.slane %v1593_v31, 6 }
  0x93   :  { %v191_v41 = vmul.f32 %v1668_v13, %v1523_v3  ;;  %v192_v42 = vmul.f32 %v1671_v14, %v1534_v4  ;;  %v1705_v47 = vperm.slane %v1605_v34, 6 }
  0x94   :  { %549 = vperm.xlu1 %1248, %v1663_v5  }
  0x97   :  { %v145_v20 = vpop.permute.xlu1 %144 }
  0x98   :  { %v1576_v22 = vpop.permute.xlu0 %182  ;;  %v1587_v30 = vpop.permute.xlu2 %220  ;;  %v147_v55 = vmul.f32 %v145_v20, %v141_v48  ;;  %v148_v61 = vmul.f32 %v145_v20, %v142_v54  ;;  %v1683_v20 = vperm.slane %v1605_v34, 5 }
  0x9c   :  { %1251 = vset.pattern.permute.xlu1 %v2413_v8 }
  0x9f   :  { %v173_v23 = vpop.permute.xlu1 %172 }
  0xa0   :  { %v1644_v51 = vpop.permute.xlu2 %239  ;;  %v176_v59 = vsel %vm174_vm3, %v173_v23, %v171_v18  ;;  %v175_v10 = vsel %vm174_vm3, %v171_v18, %v173_v23  ;;  %v1680_v18 = vperm.slane %v1593_v31, 5  ;;  %v167_v23 = vmul.f32 %v1574_v21, %v161_v60 }
  0xa1   :  { %v126_v25 = vpop.permute.xlu0 %125  ;;  %v179_v17 = vmul.f32 %v1651_v56, %v176_v59 }
  0xa2   :  { %v128_v50 = vmul.f32 %v126_v25, %v121_v45  ;;  %v129_v57 = vmul.f32 %v126_v25, %v122_v49  ;;  %v180_v25 = vmul.f32 %v1657_v62, %v175_v10 }
  0xa3   :  { %v185_v21 = vmul.f32 %v1576_v22, %v179_v17 }
  0xa4   :  { %v149_v63 = vadd.f32 %v147_v55, %v128_v50  ;;  %v150_v19 = vadd.f32 %v148_v61, %v129_v57  ;;  %v186_v50 = vmul.f32 %v1576_v22, %v180_v25 }
  0xa6   :  { %v168_v27 = vadd.f32 %v166_v16, %v149_v63  ;;  %v169_v43 = vadd.f32 %v167_v23, %v150_v19  ;;  %v1746_v63 = vld [vmem:[%s2399_s1 + $0x18] ss:$0 sm:$0xff] }
  0xa7   :  { %v1580_v26 = vpop.permute.xlu1 %201 }
  0xa8   :  { %v206_v28 = vsel %vm205_vm4, %v1580_v26, %v1578_v24  ;;  %v207_v45 = vsel %vm205_vm4, %v1578_v24, %v1580_v26  ;;  %v259_v48 = vpop.permute.xlu2 %258  ;;  %v187_v24 = vadd.f32 %v185_v21, %v168_v27  ;;  %v1717_v26 = vperm.slane %v1593_v31, 7 }
  0xa9   :  { %v223_v36 = vpop.permute.xlu0 %222  ;;  %v210_v52 = vmul.f32 %v1680_v18, %v206_v28  ;;  %v211_v53 = vmul.f32 %v1683_v20, %v207_v45  ;;  %v1728_v31 = vperm.slane %v1605_v34, 7  ;;  %v1741_v34 = vld [vmem:[%s2399_s1 + $0x10] ss:$0 sm:$0xff] }
  0xaa   :  { %v225_v49 = vsel %vm224_vm5, %v1587_v30, %v223_v36  ;;  %v226_v3 = vsel %vm224_vm5, %v223_v36, %v1587_v30  ;;  %v188_v36 = vadd.f32 %v186_v50, %v169_v43 }
  0xab   :  { %v229_v22 = vmul.f32 %v1693_v35, %v225_v49  ;;  %v230_v30 = vmul.f32 %v1705_v47, %v226_v3 }
  0xaf   :  { %v1595_v32 = vpop.permute.xlu1 %194 }
  0xb0   :  { %v197_v54 = vmul.f32 %v1595_v32, %v191_v41  ;;  %v198_v55 = vmul.f32 %v1595_v32, %v192_v42  ;;  %v271_v42 = vpop.permute.xlu2 %270 }
  0xb1   :  { %v242_v15 = vpop.permute.xlu0 %241 }
  0xb2   :  { %v244_v32 = vsel %vm243_vm6, %v1644_v51, %v242_v15  ;;  %v245_v57 = vsel %vm243_vm6, %v242_v15, %v1644_v51  ;;  %v200_v15 = vadd.f32 %v198_v55, %v188_v36  ;;  %v278_v55 = vld [vmem:[%s2402_s4 + $0x8] sm:$0xff] }
  0xb3   :  { %v248_v19 = vmul.f32 %v1717_v26, %v244_v32  ;;  %v249_v23 = vmul.f32 %v1728_v31, %v245_v57 }
  0xb8   :  { %v214_v58 = vpop.permute.xlu1 %213 }
  0xb9   :  { %v216_v59 = vmul.f32 %v214_v58, %v210_v52  ;;  %v217_v60 = vmul.f32 %v214_v58, %v211_v53  ;;  %v261_v61 = vpop.permute.xlu0 %260  ;;  %v199_v58 = vadd.f32 %v197_v54, %v187_v24  ;;  %v277_v54 = vld [vmem:[%s2402_s4] sm:$0xff] }
  0xba   :  { %v263_v10 = vsel %vm262_vm7, %v259_v48, %v261_v61  ;;  %v264_v51 = vsel %vm262_vm7, %v261_v61, %v259_v48 }
  0xbb   :  { %v218_v25 = vadd.f32 %v216_v59, %v199_v58  ;;  %v219_v27 = vadd.f32 %v217_v60, %v200_v15  ;;  %v267_v28 = vmul.f32 %v1741_v34, %v263_v10  ;;  %v268_v41 = vmul.f32 %v1746_v63, %v264_v51 }
  0xbd   :  { %v273_v3 = vmul.f32 %v271_v42, %v267_v28 }
  0xc1   :  { %v233_v4 = vpop.permute.xlu1 %232 }
  0xc2   :  { %v235_v16 = vmul.f32 %v233_v4, %v229_v22  ;;  %v236_v17 = vmul.f32 %v233_v4, %v230_v30  ;;  %v274_v4 = vmul.f32 %v271_v42, %v268_v41  ;;  %v289_v22 = vpop.permute.xlu0 %288 }
  0xc4   :  { %v237_v43 = vadd.f32 %v235_v16, %v218_v25  ;;  %v238_v45 = vadd.f32 %v236_v17, %v219_v27 }
  0xca   :  { %v252_v21 = vpop.permute.xlu1 %251  ;;  %v1775_v30 = vpop.permute.xlu0 %437 }
  0xcb   :  { %v254_v49 = vmul.f32 %v252_v21, %v248_v19  ;;  %v255_v48 = vmul.f32 %v252_v21, %v249_v23  ;;  %v1809_v21 = vpop.permute.xlu2 %405 }
  0xcd   :  { %v256_v50 = vadd.f32 %v254_v49, %v237_v43  ;;  %v257_v52 = vadd.f32 %v255_v48, %v238_v45 }
  0xcf   :  { %v275_v24 = vadd.f32 %v273_v3, %v256_v50  ;;  %v276_v53 = vadd.f32 %v274_v4, %v257_v52 }
  0xd1   :  { %313 = vmatpush.msra.mxu0 %v275_v24  ;;  %336 = vmatpush.msra.mxu1 %v276_v53 }
  0xd2   :  { %1180 = vmatmul.msk.f32.vlgmr.msra.gmra.mxu0 %vm291_vm8, %v277_v54  ;;  %1182 = vmatmul.msk.f32.vlgmr.msra.gmra.mxu1 %vm291_vm8, %v277_v54 }
  0xd3   :  { %v1777_v36 = vpop.permute.xlu0 %489  ;;  %v284_v32 = vpop.permute.xlu1 %283 }
  0xd4   :  { %v402_v43 = vpop.permute.xlu2 %401 }
  0xda   :  { %1181 = vmatmul.msk.f32.gmra.mxu0 %vm291_vm8, %v278_v55  ;;  %1183 = vmatmul.msk.f32.gmra.mxu1 %vm291_vm8, %v278_v55 }
  0xdb   :  { %v486_v58 = vpop.permute.xlu0 %485  ;;  %v1823_v45 = vpop.permute.xlu1 %373 }
  0xdc   :  { %v1825_v49 = vpop.permute.xlu2 %469 }
  0xe3   :  { %v369_v48 = vpop.permute.xlu1 %368 }
  0xe4   :  { %v1833_v3 = vpop.permute.xlu2 %465  ;;  %v518_v54 = vpop.permute.xlu0 %517 }
  0xec   :  { %v434_v4 = vpop.permute.xlu1 %433  ;;  %v1842_v50 = vpop.permute.xlu2 %585 }
  0xf5   :  { %v1847_v52 = vpop.permute.xlu1 %521 }
  0xfe   :  { %v1853_v24 = vpop.permute.xlu1 %553 }
 0x14f   :  { %v315_v57 = vpop.f32.mrf.mxu0  ;;  %v338_v59 = vpop.f32.mrf.mxu1 }
 0x150   :  { %v316_v60 = vadd.f32 %v315_v57, %v284_v32  ;;  %v339_v61 = vadd.f32 %v338_v59, %v284_v32 }
 0x152   :  { %v344_v10 = vmax.f32 %v316_v60, 0.0  ;;  %v345_v51 = vmax.f32 %v339_v61, 0.0 }
 0x154   :  { %354 = vrot.lane.b32.xlu2 %v345_v51, %s1416_s24  ;;  %384 = vrot.lane.b32.xlu0 %v344_v10, %s1415_s23  ;;  %v480_v15 = vmul.f32 %v344_v10, %v1668_v13  ;;  %v481_v16 = vmul.f32 %v345_v51, %v1671_v14 }
 0x155   :  { %350 = vrot.lane.b32.xlu1 %v344_v10, %s1416_s24 }
 0x156   :  { %v1784_v17 = vmul.f32 %v486_v58, %v480_v15  ;;  %v1786_v19 = vmul.f32 %v486_v58, %v481_v16 }
 0x157   :  { %v341_v23 = vpop.f32.mrf.mxu1  ;;  %v318_v28 = vpop.f32.mrf.mxu0 }
 0x158   :  { %v342_v25 = vadd.f32 %v341_v23, %v289_v22  ;;  %v319_v41 = vadd.f32 %v318_v28, %v289_v22  ;;  %v550_v22 = vpop.permute.xlu1 %549 }
 0x15a   :  { %v1797_v27 = vmax.f32 %v342_v25, 0.0  ;;  %v1803_v42 = vmax.f32 %v319_v41, 0.0 }
 0x15c   :  { %452 = vrot.lane.b32.xlu2 %v345_v51, %s1418_s28  ;;  %416 = vrot.lane.b32.xlu0 %v344_v10, %s1417_s25 }
 0x15d   :  { %388 = vrot.lane.b32.xlu1 %v345_v51, %s1415_s23 }
 0x164   :  { %504 = vrot.lane.b32.xlu2 %v345_v51, %s1421_s0  ;;  %536 = vrot.lane.b32.xlu0 %v345_v51, %s1422_s29 }
 0x165   :  { %420 = vrot.lane.b32.xlu1 %v345_v51, %s1417_s25 }
 0x16c   :  { %532 = vrot.lane.b32.xlu2 %v344_v10, %s1422_s29  ;;  %596 = vrot.lane.b32.xlu0 %v344_v10, %s1426_s3 }
 0x16d   :  { %448 = vrot.lane.b32.xlu1 %v344_v10, %s1418_s28 }
 0x174   :  { %564 = vrot.lane.b32.xlu2 %v344_v10, %s1424_s30  ;;  %390 = vrot.lane.b32.xlu0 %v1797_v27, %s1415_s23 }
 0x175   :  { %500 = vrot.lane.b32.xlu1 %v344_v10, %s1421_s0 }
 0x17c   :  { %352 = vrot.lane.b32.xlu2 %v1803_v42, %s1416_s24  ;;  %422 = vrot.lane.b32.xlu0 %v1797_v27, %s1417_s25 }
 0x17d   :  { %568 = vrot.lane.b32.xlu1 %v345_v51, %s1424_s30 }
 0x184   :  { %386 = vrot.lane.b32.xlu2 %v1803_v42, %s1415_s23  ;;  %454 = vrot.lane.b32.xlu0 %v1797_v27, %s1418_s28 }
 0x185   :  { %600 = vrot.lane.b32.xlu1 %v345_v51, %s1426_s3 }
 0x18c   :  { %418 = vrot.lane.b32.xlu2 %v1803_v42, %s1417_s25  ;;  %502 = vrot.lane.b32.xlu0 %v1803_v42, %s1421_s0 }
 0x18d   :  { %356 = vrot.lane.b32.xlu1 %v1797_v27, %s1416_s24 }
 0x194   :  { %450 = vrot.lane.b32.xlu2 %v1803_v42, %s1418_s28  ;;  %602 = vrot.lane.b32.xlu0 %v1797_v27, %s1426_s3 }
 0x195   :  { %506 = vrot.lane.b32.xlu1 %v1797_v27, %s1421_s0 }
 0x19c   :  { %538 = vrot.lane.b32.xlu2 %v1797_v27, %s1422_s29  ;;  %617 = vperm.xlu0 %1250, %v1612_v37  }
 0x19d   :  { %534 = vrot.lane.b32.xlu1 %v1803_v42, %s1422_s29 }
 0x1a4   :  { %570 = vrot.lane.b32.xlu2 %v1797_v27, %s1424_s30  ;;  %1255 = vset.pattern.permute.xlu0 %v2420_v2 }
 0x1a5   :  { %566 = vrot.lane.b32.xlu1 %v1803_v42, %s1424_s30 }
 0x1ac   :  { %598 = vrot.lane.b32.xlu2 %v1803_v42, %s1426_s3 }
 0x1ad   :  { %613 = vperm.xlu1 %1251, %v1663_v5  }
 0x1ae   :  { %v355_v37 = vpop.permute.xlu2 %354 }
 0x1b4   :  { %581 = vperm.xlu2 %1249, %v1663_v5  }
 0x1b5   :  { %1253 = vset.pattern.permute.xlu1 %v2411_v6 }
 0x1b6   :  { %v453_v53 = vpop.permute.xlu2 %452 }
 0x1bc   :  { %1252 = vset.pattern.permute.xlu2 %v2411_v6 }
 0x1be   :  { %v505_v55 = vpop.permute.xlu2 %504 }
 0x1c6   :  { %v533_v32 = vpop.permute.xlu2 %532  ;;  %v385_v57 = vpop.permute.xlu0 %384 }
 0x1c7   :  { %v351_v59 = vpop.permute.xlu1 %350 }
 0x1c8   :  { %v358_v60 = vsel %vm116_vm0, %v351_v59, %v355_v37  ;;  %v360_v61 = vsel %vm116_vm0, %v355_v37, %v351_v59 }
 0x1c9   :  { %v362_v9 = vmul.f32 %v360_v61, %v1599_v33 }
 0x1ce   :  { %v1861_v5 = vpop.permute.xlu2 %564  ;;  %v417_v10 = vpop.permute.xlu0 %416 }
 0x1cf   :  { %v389_v51 = vpop.permute.xlu1 %388 }
 0x1d0   :  { %v392_v58 = vsel %vm136_vm1, %v385_v57, %v389_v51  ;;  %v394_v15 = vsel %vm136_vm1, %v389_v51, %v385_v57 }
 0x1d1   :  { %v396_v51 = vmul.f32 %v394_v15, %v1615_v38  ;;  %v397_v8 = vmul.f32 %v392_v58, %v1632_v44 }
 0x1d3   :  { %v409_v0 = vmul.f32 %v402_v43, %v397_v8 }
 0x1d6   :  { %v1867_v16 = vpop.permute.xlu2 %352  ;;  %v537_v23 = vpop.permute.xlu0 %536 }
 0x1d7   :  { %v540_v25 = vsel %vm224_vm5, %v533_v32, %v537_v23  ;;  %v542_v28 = vsel %vm224_vm5, %v537_v23, %v533_v32  ;;  %v421_v41 = vpop.permute.xlu1 %420  ;;  %v363_v32 = vmul.f32 %v358_v60, %v1618_v39 }
 0x1d8   :  { %v544_v37 = vmul.f32 %v540_v25, %v1693_v35  ;;  %v545_v59 = vmul.f32 %v542_v28, %v1705_v47  ;;  %v424_v6 = vsel %vm155_vm2, %v417_v10, %v421_v41  ;;  %v426_v57 = vsel %vm155_vm2, %v421_v41, %v417_v10 }
 0x1d9   :  { %v428_v23 = vmul.f32 %v426_v57, %v1622_v40  ;;  %v429_v25 = vmul.f32 %v424_v6, %v1637_v46  ;;  %v408_v28 = vmul.f32 %v402_v43, %v396_v51  ;;  %v376_v10 = vmul.f32 %v369_v48, %v362_v9 }
 0x1da   :  { %v556_v11 = vmul.f32 %v550_v22, %v544_v37  ;;  %v557_v12 = vmul.f32 %v550_v22, %v545_v59  ;;  %v377_v41 = vmul.f32 %v369_v48, %v363_v32 }
 0x1db   :  { %v440_v15 = vmul.f32 %v434_v4, %v428_v23  ;;  %v441_v1 = vmul.f32 %v434_v4, %v429_v25  ;;  %v412_v61 = vadd.f32 %v408_v28, %v376_v10 }
 0x1dc   :  { %v413_v37 = vadd.f32 %v409_v0, %v377_v41 }
 0x1dd   :  { %v444_v43 = vadd.f32 %v440_v15, %v412_v61 }
 0x1de   :  { %v387_v2 = vpop.permute.xlu2 %386  ;;  %v1885_v7 = vpop.permute.xlu0 %596  ;;  %v445_v59 = vadd.f32 %v441_v1, %v413_v37 }
 0x1df   :  { %v449_v58 = vpop.permute.xlu1 %448 }
 0x1e0   :  { %v456_v22 = vsel %vm174_vm3, %v449_v58, %v453_v53  ;;  %v458_v60 = vsel %vm174_vm3, %v453_v53, %v449_v58 }
 0x1e1   :  { %v460_v6 = vmul.f32 %v458_v60, %v1651_v56  ;;  %v461_v8 = vmul.f32 %v456_v22, %v1657_v62 }
 0x1e3   :  { %v472_v9 = vmul.f32 %v1833_v3, %v460_v6  ;;  %v473_v48 = vmul.f32 %v1833_v3, %v461_v8 }
 0x1e5   :  { %v476_v4 = vadd.f32 %v472_v9, %v444_v43  ;;  %v477_v57 = vadd.f32 %v473_v48, %v445_v59 }
 0x1e6   :  { %v419_v51 = vpop.permute.xlu2 %418  ;;  %v391_v25 = vpop.permute.xlu0 %390 }
 0x1e7   :  { %v497_v32 = vadd.f32 %v1786_v19, %v477_v57  ;;  %v501_v23 = vpop.permute.xlu1 %500  ;;  %v496_v53 = vadd.f32 %v1784_v17, %v476_v4  ;;  %v393_v43 = vsel %vm136_vm1, %v387_v2, %v391_v25 }
 0x1e8   :  { %v508_v0 = vsel %vm205_vm4, %v501_v23, %v505_v55  ;;  %v510_v28 = vsel %vm205_vm4, %v505_v55, %v501_v23  ;;  %v399_v4 = vmul.f32 %v393_v43, %v1632_v44 }
 0x1e9   :  { %v512_v1 = vmul.f32 %v508_v0, %v1680_v18  ;;  %v513_v10 = vmul.f32 %v510_v28, %v1683_v20 }
 0x1ea   :  { %v411_v0 = vmul.f32 %v1809_v21, %v399_v4  ;;  %v482_v4 = vmul.f32 %v1803_v42, %v1668_v13 }
 0x1eb   :  { %v524_v3 = vmul.f32 %v518_v54, %v512_v1  ;;  %v525_v41 = vmul.f32 %v518_v54, %v513_v10  ;;  %v395_v54 = vsel %vm136_vm1, %v391_v25, %v387_v2 }
 0x1ec   :  { %v398_v48 = vmul.f32 %v395_v54, %v1615_v38  ;;  %v630_v54 = vld [vmem:[%s2406_s8] sm:$0xff] }
 0x1ed   :  { %v528_v15 = vadd.f32 %v524_v3, %v496_v53  ;;  %v529_v58 = vadd.f32 %v525_v41, %v497_v32  ;;  %634 = vperm.xlu2 %1252, %v630_v54  }
 0x1ee   :  { %v451_v60 = vpop.permute.xlu2 %450  ;;  %v423_v61 = vpop.permute.xlu0 %422  ;;  %v410_v25 = vmul.f32 %v1809_v21, %v398_v48 }
 0x1ef   :  { %v1903_v22 = vpop.permute.xlu1 %568  ;;  %v1905_v19 = vadd.f32 %v556_v11, %v528_v15  ;;  %v1907_v17 = vadd.f32 %v557_v12, %v529_v58  ;;  %v425_v57 = vsel %vm155_vm2, %v419_v51, %v423_v61  ;;  %v427_v2 = vsel %vm155_vm2, %v423_v61, %v419_v51 }
 0x1f0   :  { %v430_v28 = vmul.f32 %v427_v2, %v1622_v40  ;;  %v431_v1 = vmul.f32 %v425_v57, %v1637_v46  ;;  %v483_v57 = vmul.f32 %v1797_v27, %v1671_v14  ;;  %v494_v27 = vmul.f32 %v1777_v36, %v482_v4 }
 0x1f2   :  { %v443_v58 = vmul.f32 %v1775_v30, %v431_v1  ;;  %v495_v1 = vmul.f32 %v1777_v36, %v483_v57  ;;  %v2432_v36 = vmov 1  }
 0x1f6   :  { %v539_v6 = vpop.permute.xlu2 %538  ;;  %v455_v55 = vpop.permute.xlu0 %454 }
 0x1f7   :  { %v1909_v37 = vpop.permute.xlu1 %600  ;;  %v457_v3 = vsel %vm174_vm3, %v451_v60, %v455_v55  ;;  %v459_v51 = vsel %vm174_vm3, %v455_v55, %v451_v60  ;;  %v631_v60 = vld [vmem:[%s2406_s8 + $0x8] sm:$0xff] }
 0x1f8   :  { %v462_v61 = vmul.f32 %v459_v51, %v1651_v56  ;;  %v463_v21 = vmul.f32 %v457_v3, %v1657_v62  ;;  %639 = vperm.xlu1 %1253, %v631_v60  }
 0x1fe   :  { %v1929_v32 = vpop.permute.xlu2 %570  ;;  %v503_v53 = vpop.permute.xlu0 %502 }
 0x1ff   :  { %v357_v8 = vpop.permute.xlu1 %356 }
 0x200   :  { %v359_v11 = vsel %vm116_vm0, %v1867_v16, %v357_v8  ;;  %v361_v12 = vsel %vm116_vm0, %v357_v8, %v1867_v16  ;;  %1254 = vset.pattern.permute.xlu1 %v2432_v36  ;;  %v629_v36 = vld [vmem:[#allocation7 + $0x8] sm:$0xff] }
 0x201   :  { %v364_v59 = vmul.f32 %v361_v12, %v1599_v33  ;;  %v365_v9 = vmul.f32 %v359_v11, %v1618_v39  ;;  %v1955_v11 = vld [vmem:[#allocation8] sm:$0xff]  ;;  %v474_v12 = vmul.f32 %v1825_v49, %v462_v61 }
 0x202   :  { %841 = vperm.xlu0 %1255, %v1955_v11   ;;  %776 = vperm.xlu2 %1252, %v1955_v11  }
 0x203   :  { %v378_v23 = vmul.f32 %v1823_v45, %v364_v59  ;;  %v379_v16 = vmul.f32 %v1823_v45, %v365_v9  ;;  %v442_v45 = vmul.f32 %v1775_v30, %v430_v28  ;;  %v475_v59 = vmul.f32 %v1825_v49, %v463_v21  ;;  %809 = vperm.xlu1 %1254, %v1955_v11  }
 0x204   :  { %v2433_v21 = vmov 4  }
 0x205   :  { %v414_v41 = vadd.f32 %v410_v25, %v378_v23  ;;  %v415_v15 = vadd.f32 %v411_v0, %v379_v16 }
 0x206   :  { %v599_v9 = vpop.permute.xlu2 %598  ;;  %v603_v2 = vpop.permute.xlu0 %602 }
 0x207   :  { %v507_v10 = vpop.permute.xlu1 %506  ;;  %v446_v8 = vadd.f32 %v442_v45, %v414_v41  ;;  %v447_v43 = vadd.f32 %v443_v58, %v415_v15  ;;  %v605_v45 = vsel %vm262_vm7, %v599_v9, %v603_v2  ;;  %v607_v58 = vsel %vm262_vm7, %v603_v2, %v599_v9 }
 0x208   :  { %v509_v55 = vsel %vm205_vm4, %v503_v53, %v507_v10  ;;  %v511_v30 = vsel %vm205_vm4, %v507_v10, %v503_v53  ;;  %v572_v10 = vsel %vm243_vm6, %v1861_v5, %v1903_v22  ;;  %v606_v9 = vsel %vm262_vm7, %v1909_v37, %v1885_v7 }
 0x209   :  { %v514_v53 = vmul.f32 %v509_v55, %v1680_v18  ;;  %v515_v49 = vmul.f32 %v511_v30, %v1683_v20  ;;  %v478_v25 = vadd.f32 %v474_v12, %v446_v8  ;;  %v479_v0 = vadd.f32 %v475_v59, %v447_v43 }
 0x20a   :  { %1258 = vset.pattern.permute.xlu0 %v2433_v21  ;;  %v604_v59 = vsel %vm262_vm7, %v1885_v7, %v1909_v37  ;;  %v609_v37 = vmul.f32 %v1746_v63, %v606_v9 }
 0x20b   :  { %v526_v3 = vmul.f32 %v1847_v52, %v514_v53  ;;  %v527_v51 = vmul.f32 %v1847_v52, %v515_v49  ;;  %v498_v41 = vadd.f32 %v494_v27, %v478_v25  ;;  %v499_v15 = vadd.f32 %v495_v1, %v479_v0  ;;  %893 = vperm.xlu0 %1258, %v1955_v11   ;;  %v2017_v53 = vld [vmem:[#allocation8 + $0x8] sm:$0xff] }
 0x20c   :  { %v576_v52 = vmul.f32 %v572_v10, %v1717_v26  ;;  %v608_v7 = vmul.f32 %v1741_v34, %v604_v59  ;;  %781 = vperm.xlu2 %1252, %v2017_v53   ;;  %813 = vperm.xlu1 %1254, %v2017_v53  }
 0x20d   :  { %v530_v30 = vadd.f32 %v526_v3, %v498_v41  ;;  %v531_v12 = vadd.f32 %v527_v51, %v499_v15 }
 0x20e   :  { %v618_v4 = vpop.permute.xlu0 %617 }
 0x20f   :  { %v535_v48 = vpop.permute.xlu1 %534 }
 0x210   :  { %v541_v23 = vsel %vm224_vm5, %v535_v48, %v539_v6  ;;  %v543_v16 = vsel %vm224_vm5, %v539_v6, %v535_v48  ;;  %v574_v6 = vsel %vm243_vm6, %v1903_v22, %v1861_v5  ;;  %v611_v48 = vmul.f32 %v1746_v63, %v607_v58  ;;  %v628_v63 = vld [vmem:[#allocation7] sm:$0xff] }
 0x211   :  { %v546_v42 = vmul.f32 %v541_v23, %v1693_v35  ;;  %v547_v28 = vmul.f32 %v543_v16, %v1705_v47  ;;  %v577_v8 = vmul.f32 %v574_v6, %v1728_v31  ;;  %v2437_v58 = vmov 7  }
 0x213   :  { %v558_v61 = vmul.f32 %v1853_v24, %v546_v42  ;;  %v559_v5 = vmul.f32 %v1853_v24, %v547_v28  ;;  %v582_v24 = vpop.permute.xlu2 %581  ;;  %v623_v42 = vmul.f32 %v618_v4, %v611_v48  ;;  %897 = vperm.xlu0 %1258, %v2017_v53  }
 0x214   :  { %v588_v49 = vmul.f32 %v582_v24, %v576_v52  ;;  %v589_v25 = vmul.f32 %v582_v24, %v577_v8 }
 0x215   :  { %v562_v57 = vadd.f32 %v558_v61, %v530_v30  ;;  %v563_v23 = vadd.f32 %v559_v5, %v531_v12  ;;  %v2438_v61 = vmov 6  }
 0x216   :  { %v592_v51 = vadd.f32 %v588_v49, %v1905_v19  ;;  %v593_v41 = vadd.f32 %v589_v25, %v1907_v17  ;;  %v2435_v19 = vmov 3   ;;  %v2436_v17 = vmov 5  }
 0x217   :  { %v567_v22 = vpop.permute.xlu1 %566  ;;  %1257 = vset.pattern.permute.xlu1 %v2435_v19 }
 0x218   :  { %v573_v43 = vsel %vm243_vm6, %v567_v22, %v1929_v32  ;;  %v575_v54 = vsel %vm243_vm6, %v1929_v32, %v567_v22  ;;  %v610_v32 = vmul.f32 %v1741_v34, %v605_v45  ;;  %v2434_v45 = vmov 2   ;;  %873 = vperm.xlu1 %1257, %v1955_v11  }
 0x219   :  { %v578_v60 = vmul.f32 %v573_v43, %v1717_v26  ;;  %v579_v55 = vmul.f32 %v575_v54, %v1728_v31  ;;  %1256 = vset.pattern.permute.xlu2 %v2434_v45 }
 0x21a   :  { %v622_v0 = vmul.f32 %v618_v4, %v610_v32  ;;  %845 = vperm.xlu2 %1256, %v2017_v53   ;;  %v2439_v4 = vmov 8  }
 0x21b   :  { %v590_v2 = vmul.f32 %v1842_v50, %v578_v60  ;;  %v591_v16 = vmul.f32 %v1842_v50, %v579_v55  ;;  %1260 = vset.pattern.permute.xlu0 %v2436_v17 }
 0x21d   :  { %v594_v28 = vadd.f32 %v590_v2, %v562_v57  ;;  %v595_v27 = vadd.f32 %v591_v16, %v563_v23  ;;  %v1429_v2 = vmov 256.0  }
 0x21e   :  { %1270 = vrcp.f32 %v1429_v2 }
 0x21f   :  { %v614_v1 = vpop.permute.xlu1 %613  ;;  %v626_v10 = vadd.f32 %v622_v0, %v594_v28  ;;  %v627_v6 = vadd.f32 %v623_v42, %v595_v27 }
 0x220   :  { %v620_v50 = vmul.f32 %v614_v1, %v608_v7  ;;  %v621_v3 = vmul.f32 %v614_v1, %v609_v37  ;;  %877 = vperm.xlu1 %1257, %v2017_v53  }
 0x221   :  { %663 = vmatpush.msra.mxu2 %v626_v10  ;;  %686 = vmatpush.msra.mxu3 %v627_v6 }
 0x222   :  { %v624_v34 = vadd.f32 %v620_v50, %v592_v51  ;;  %v625_v15 = vadd.f32 %v621_v3, %v593_v41  ;;  %1259 = vset.pattern.permute.xlu2 %v2436_v17 }
 0x223   :  { %925 = vperm.xlu2 %1259, %v1955_v11  }
 0x224   :  { %664 = vmatpush.msra.mxu2 %v624_v34  ;;  %687 = vmatpush.msra.mxu3 %v625_v15  ;;  %v1271_v16 = vpop.eup %1270 }
 0x225   :  { %1184 = vmatmul.msk.f32.vlgmr.msra.gmra.mxu2 %vm642_vm9, %v628_v63  ;;  %1186 = vmatmul.msk.f32.vlgmr.msra.gmra.mxu3 %vm642_vm9, %v628_v63  ;;  %v706_v0 = vmul.f32 256.0, %v1271_v16  ;;  %vm710_vm10 = vweird.f32 %v1271_v16 }
 0x227   :  { %v707_v42 = vsub.f32 1.0, %v706_v0 }
 0x228   :  { %1262 = vset.pattern.permute.xlu1 %v2437_v58 }
 0x229   :  { %989 = vperm.xlu1 %1262, %v1955_v11   ;;  %v708_v27 = vmul.f32 %v1271_v16, %v707_v42 }
 0x22b   :  { %1261 = vset.pattern.permute.xlu2 %v2438_v61  ;;  %v709_v37 = vadd.f32 %v1271_v16, %v708_v27 }
 0x22d   :  { %1185 = vmatmul.msk.f32.gmra.mxu2 %vm642_vm9, %v629_v36  ;;  %1187 = vmatmul.msk.f32.gmra.mxu3 %vm642_vm9, %v629_v36  ;;  %v711_v1 = vsel %vm710_vm10, %v1271_v16, %v709_v37 }
 0x247   :  { %v635_v5 = vpop.permute.xlu2 %634 }
 0x25c   :  { %v2046_v57 = vpop.permute.xlu2 %776 }
 0x266   :  { %v2048_v23 = vpop.permute.xlu2 %781 }
 0x26a   :  { %v640_v60 = vpop.permute.xlu1 %639 }
 0x274   :  { %v2050_v49 = vpop.permute.xlu0 %841  ;;  %v2052_v25 = vpop.permute.xlu2 %845 }
 0x27d   :  { %v2054_v28 = vpop.permute.xlu0 %893  ;;  %v2056_v7 = vpop.permute.xlu2 %925 }
 0x285   :  { %v2058_v10 = vpop.permute.xlu0 %897 }
 0x286   :  { %2440 = vst [vmem:[#allocation15_spill] sm:$0xff] %v2058_v10  ;;  %v1055_v10 = vld [vmem:[#allocation2 + $0x98] sm:$0xff] }
 0x2a8   :  { %v666_v22 = vpop.f32.mrf.mxu2  ;;  %v689_v21 = vpop.f32.mrf.mxu3 }
 0x2a9   :  { %v667_v52 = vadd.f32 %v666_v22, %v635_v5  ;;  %v690_v8 = vadd.f32 %v689_v21, %v635_v5  ;;  %v2060_v5 = vpop.permute.xlu1 %809 }
 0x2ab   :  { %v695_v43 = vmax.f32 %v667_v52, 0.0  ;;  %v696_v54 = vmax.f32 %v690_v8, 0.0 }
 0x2ad   :  { %v699_v24 = vadd.f32 %v696_v54, %v695_v43 }
 0x2af   :  { %700 = vadd.xlane.f32.xlu2 %v699_v24 }
 0x2b0   :  { %v692_v55 = vpop.f32.mrf.mxu3  ;;  %v669_v30 = vpop.f32.mrf.mxu2 }
 0x2b1   :  { %v693_v12 = vadd.f32 %v692_v55, %v640_v60  ;;  %v670_v59 = vadd.f32 %v669_v30, %v640_v60  ;;  %v2062_v22 = vpop.permute.xlu1 %813 }
 0x2b3   :  { %v698_v9 = vmax.f32 %v693_v12, 0.0  ;;  %v697_v32 = vmax.f32 %v670_v59, 0.0 }
 0x2b5   :  { %v702_v48 = vadd.f32 %v698_v9, %v697_v32 }
 0x2b7   :  { %703 = vadd.xlane.f32.xlu0 %v702_v48 }
 0x2b9   :  { %v2064_v21 = vpop.permute.xlu1 %873 }
 0x2c1   :  { %v2066_v52 = vpop.permute.xlu1 %877 }
 0x2c2   :  { %2441 = vst [vmem:[#allocation16_spill] sm:$0xff] %v2066_v52  ;;  %v1054_v52 = vld [vmem:[#allocation2 + $0x90] sm:$0xff] }
 0x2c7   :  { %957 = vperm.xlu2 %1261, %v1955_v11  }
 0x2c9   :  { %v2068_v8 = vpop.permute.xlu1 %989 }
 0x2ca   :  { %2442 = vst [vmem:[#allocation17_spill] sm:$0xff] %v2068_v8 }
 0x2cb   :  { %929 = vperm.xlu0 %1260, %v2017_v53  }
 0x2cf   :  { %961 = vperm.xlu2 %1261, %v2017_v53  }
 0x2d3   :  { %1263 = vset.pattern.permute.xlu0 %v2439_v4 }
 0x2d7   :  { %1264 = vset.pattern.permute.xlu2 %v2439_v4 }
 0x322   :  { %v701_v6 = vpop.xlane.xlu2 %700 }
 0x323   :  { %v712_v50 = vmul.f32 %v711_v1, %v701_v6 }
 0x325   :  { %v714_v3 = vsub.f32 %v695_v43, %v712_v50  ;;  %v715_v51 = vsub.f32 %v696_v54, %v712_v50 }
 0x327   :  { %v718_v41 = vmul.f32 %v714_v3, %v714_v3  ;;  %v719_v34 = vmul.f32 %v715_v51, %v715_v51 }
 0x329   :  { %v722_v15 = vadd.f32 %v719_v34, %v718_v41 }
 0x32a   :  { %v704_v63 = vpop.xlane.xlu0 %703  ;;  %v2070_v43 = vpop.permute.xlu2 %957 }
 0x32b   :  { %v713_v45 = vmul.f32 %v711_v1, %v704_v63  ;;  %723 = vadd.xlane.f32.xlu1 %v722_v15  ;;  %v2446_v63 = vmov 0  }
 0x32d   :  { %v716_v19 = vsub.f32 %v697_v32, %v713_v45  ;;  %v717_v17 = vsub.f32 %v698_v9, %v713_v45 }
 0x32f   :  { %v720_v36 = vmul.f32 %v716_v19, %v716_v19  ;;  %v721_v58 = vmul.f32 %v717_v17, %v717_v17 }
 0x331   :  { %v725_v61 = vadd.f32 %v721_v58, %v720_v36 }
 0x332   :  { %v2072_v55 = vpop.permute.xlu2 %961 }
 0x333   :  { %726 = vadd.xlane.f32.xlu2 %v725_v61  ;;  %2443 = vst [vmem:[#allocation18_spill] sm:$0xff] %v2072_v55 }
 0x39e   :  { %v724_v54 = vpop.xlane.xlu1 %723 }
 0x39f   :  { %v728_v24 = vmul.f32 %v724_v54, %v711_v1 }
 0x3a1   :  { %v730_v60 = vadd.f32 0.001, %v728_v24 }
 0x3a3   :  { %1272 = vrsqrt.f32 %v730_v60  ;;  %vm738_vm12 = vweird.f32 %v730_v60 }
 0x3a6   :  { %v727_v59 = vpop.xlane.xlu2 %726 }
 0x3a7   :  { %v729_v48 = vmul.f32 %v727_v59, %v711_v1  ;;  %v1067_v59 = vld [vmem:[#allocation2 + $0xf8] sm:$0xff] }
 0x3a8   :  { %1091 = vmatpush.msrb.mxu1 %v1067_v59  ;;  %v1061_v59 = vld [vmem:[#allocation2 + $0xc8] sm:$0xff] }
 0x3a9   :  { %v1273_v30 = vpop.eup %1272  ;;  %v731_v16 = vadd.f32 0.001, %v729_v48 }
 0x3aa   :  { %v733_v12 = vmul.f32 %v1273_v30, %v730_v60  ;;  %vm739_vm11 = vweird.f32 %v1273_v30 }
 0x3ab   :  { %vm740_vm13 = vmor %vm738_vm12, %vm739_vm11  ;;  %1274 = vrsqrt.f32 %v731_v16  ;;  %vm748_vm15 = vweird.f32 %v731_v16 }
 0x3ac   :  { %v734_v9 = vmul.f32 %v1273_v30, %v733_v12  ;;  %v1051_v12 = vld [vmem:[#allocation2 + $0x78] sm:$0xff] }
 0x3ad   :  { %1068 = vmatpush.msrb.mxu0 %v1051_v12  ;;  %1190 = vmatpush.msrb.mxu3 %v1051_v12  ;;  %v1045_v12 = vld [vmem:[#allocation2 + $0x48] sm:$0xff] }
 0x3ae   :  { %v735_v32 = vmul.f32 0.5, %v734_v9  ;;  %v1050_v9 = vld [vmem:[#allocation2 + $0x70] sm:$0xff] }
 0x3af   :  { %1069 = vmatpush.msrb.mxu0 %v1050_v9  ;;  %1191 = vmatpush.msrb.mxu3 %v1050_v9  ;;  %v1044_v9 = vld [vmem:[#allocation2 + $0x40] sm:$0xff] }
 0x3b0   :  { %v736_v4 = vsub.f32 1.5, %v735_v32  ;;  %v1066_v32 = vld [vmem:[#allocation2 + $0xf0] sm:$0xff] }
 0x3b1   :  { %v1275_v37 = vpop.eup %1274  ;;  %1092 = vmatpush.msrb.mxu1 %v1066_v32  ;;  %v1060_v32 = vld [vmem:[#allocation2 + $0xc0] sm:$0xff] }
 0x3b2   :  { %v737_v2 = vmul.f32 %v1273_v30, %v736_v4  ;;  %v743_v1 = vmul.f32 %v1275_v37, %v731_v16  ;;  %vm749_vm14 = vweird.f32 %v1275_v37  ;;  %v1065_v16 = vld [vmem:[#allocation2 + $0xe8] sm:$0xff] }
 0x3b3   :  { %vm750_vm8 = vmor %vm748_vm15, %vm749_vm14  ;;  %1093 = vmatpush.msrb.mxu1 %v1065_v16  ;;  %v1059_v16 = vld [vmem:[#allocation2 + $0xb8] sm:$0xff] }
 0x3b4   :  { %v741_v0 = vsel %vm740_vm13, %v1273_v30, %v737_v2  ;;  %v744_v6 = vmul.f32 %v1275_v37, %v743_v1  ;;  %v1049_v2 = vld [vmem:[#allocation2 + $0x68] sm:$0xff] }
 0x3b5   :  { %v2074_v42 = vmul.f32 %v741_v0, %v714_v3  ;;  %v2076_v27 = vmul.f32 %v741_v0, %v715_v51  ;;  %1070 = vmatpush.msrb.mxu0 %v1049_v2  ;;  %v1048_v0 = vld [vmem:[#allocation2 + $0x60] sm:$0xff]  ;;  %1192 = vmatpush.msrb.mxu3 %v1049_v2  ;;  %v1043_v2 = vld [vmem:[#allocation2 + $0x38] sm:$0xff] }
 0x3b6   :  { %v745_v50 = vmul.f32 0.5, %v744_v6  ;;  %v1047_v6 = vld [vmem:[#allocation2 + $0x58] sm:$0xff] }
 0x3b7   :  { %762 = vrot.lane.b32.xlu0 %v2076_v27, %s1416_s24  ;;  %792 = vrot.lane.b32.xlu1 %v2074_v42, %s1415_s23 }
 0x3b8   :  { %758 = vrot.lane.b32.xlu2 %v2074_v42, %s1416_s24  ;;  %v746_v3 = vsub.f32 1.5, %v745_v50  ;;  %1071 = vmatpush.msrb.mxu0 %v1048_v0  ;;  %v1063_v50 = vld [vmem:[#allocation2 + $0xd8] sm:$0xff] }
 0x3b9   :  { %1193 = vmatpush.msrb.mxu3 %v1048_v0  ;;  %v1042_v0 = vld [vmem:[#allocation2 + $0x30] sm:$0xff] }
 0x3ba   :  { %v747_v51 = vmul.f32 %v1275_v37, %v746_v3  ;;  %1072 = vmatpush.msrb.mxu0 %v1047_v6 }
 0x3bb   :  { %1194 = vmatpush.msrb.mxu3 %v1047_v6  ;;  %v1041_v6 = vld [vmem:[#allocation2 + $0x28] sm:$0xff] }
 0x3bc   :  { %v751_v41 = vsel %vm750_vm8, %v1275_v37, %v747_v51  ;;  %v1064_v37 = vld [vmem:[#allocation2 + $0xe0] sm:$0xff] }
 0x3bd   :  { %v2102_v34 = vmul.f32 %v751_v41, %v716_v19  ;;  %v2110_v15 = vmul.f32 %v751_v41, %v717_v17  ;;  %v2156_v17 = vpop.permute.xlu0 %929  ;;  %1094 = vmatpush.msrb.mxu1 %v1064_v37  ;;  %v1046_v41 = vld [vmem:[#allocation2 + $0x50] sm:$0xff] }
 0x3be   :  { %2447 = vst [vmem:[#allocation21_spill] sm:$0xff] %v2156_v17  ;;  %1073 = vmatpush.msrb.mxu0 %v1046_v41  ;;  %1195 = vmatpush.msrb.mxu3 %v1046_v41  ;;  %v1040_v41 = vld [vmem:[#allocation2 + $0x20] sm:$0xff]  ;;  %v1039_v17 = vld [vmem:[#allocation2 + $0x18] sm:$0xff] }
 0x3bf   :  { %796 = vrot.lane.b32.xlu0 %v2076_v27, %s1415_s23  ;;  %824 = vrot.lane.b32.xlu1 %v2074_v42, %s1417_s25  ;;  %2444 = vst [vmem:[#allocation19_spill] sm:$0xff] %v2102_v34 }
 0x3c0   :  { %912 = vrot.lane.b32.xlu2 %v2076_v27, %s1421_s0  ;;  %2445 = vst [vmem:[#allocation20_spill] sm:$0xff] %v2110_v15  ;;  %1095 = vmatpush.msrb.mxu1 %v1063_v50  ;;  %v1058_v50 = vld [vmem:[#allocation2 + $0xb0] sm:$0xff] }
 0x3c1   :  { %1074 = vmatpush.msrb.mxu0 %v1045_v12  ;;  %1196 = vmatpush.msrb.mxu3 %v1045_v12  ;;  %v1038_v12 = vld [vmem:[#allocation2 + $0x10] sm:$0xff] }
 0x3c3   :  { %1075 = vmatpush.msrb.mxu0 %v1044_v9  ;;  %1197 = vmatpush.msrb.mxu3 %v1044_v9 }
 0x3c5   :  { %1076 = vmatpush.msrb.mxu0 %v1043_v2  ;;  %1198 = vmatpush.msrb.mxu3 %v1043_v2 }
 0x3c7   :  { %828 = vrot.lane.b32.xlu0 %v2076_v27, %s1417_s25  ;;  %856 = vrot.lane.b32.xlu1 %v2074_v42, %s1418_s28 }
 0x3c8   :  { %940 = vrot.lane.b32.xlu2 %v2074_v42, %s1422_s29  ;;  %1077 = vmatpush.msrb.mxu0 %v1042_v0 }
 0x3c9   :  { %1199 = vmatpush.msrb.mxu3 %v1042_v0  ;;  %v1037_v0 = vld [vmem:[#allocation2 + $0x8] sm:$0xff] }
 0x3ca   :  { %1078 = vmatpush.msrb.mxu0 %v1041_v6 }
 0x3cb   :  { %1200 = vmatpush.msrb.mxu3 %v1041_v6 }
 0x3cc   :  { %1079 = vmatpush.msrb.mxu0 %v1040_v41 }
 0x3cd   :  { %1201 = vmatpush.msrb.mxu3 %v1040_v41 }
 0x3ce   :  { %1080 = vmatpush.msrb.mxu0 %v1039_v17 }
 0x3cf   :  { %860 = vrot.lane.b32.xlu0 %v2076_v27, %s1418_s28  ;;  %944 = vrot.lane.b32.xlu1 %v2076_v27, %s1422_s29 }
 0x3d0   :  { %972 = vrot.lane.b32.xlu2 %v2074_v42, %s1424_s30  ;;  %1081 = vmatpush.msrb.mxu0 %v1038_v12 }
 0x3d1   :  { %1202 = vmatpush.msrb.mxu3 %v1039_v17 }
 0x3d2   :  { %1082 = vmatpush.msrb.mxu0 %v1037_v0 }
 0x3d3   :  { %1203 = vmatpush.msrb.mxu3 %v1038_v12 }
 0x3d5   :  { %1204 = vmatpush.msrb.mxu3 %v1037_v0 }
 0x3d7   :  { %908 = vrot.lane.b32.xlu0 %v2074_v42, %s1421_s0  ;;  %976 = vrot.lane.b32.xlu1 %v2076_v27, %s1424_s30 }
 0x3d8   :  { %760 = vrot.lane.b32.xlu2 %v2102_v34, %s1416_s24 }
 0x3df   :  { %1008 = vrot.lane.b32.xlu0 %v2076_v27, %s1426_s3  ;;  %1004 = vrot.lane.b32.xlu1 %v2074_v42, %s1426_s3 }
 0x3e0   :  { %798 = vrot.lane.b32.xlu2 %v2110_v15, %s1415_s23 }
 0x3e7   :  { %764 = vrot.lane.b32.xlu1 %v2110_v15, %s1416_s24  ;;  %794 = vrot.lane.b32.xlu0 %v2102_v34, %s1415_s23 }
 0x3e8   :  { %830 = vrot.lane.b32.xlu2 %v2110_v15, %s1417_s25 }
 0x3ef   :  { %862 = vrot.lane.b32.xlu1 %v2110_v15, %s1418_s28  ;;  %826 = vrot.lane.b32.xlu0 %v2102_v34, %s1417_s25 }
 0x3f0   :  { %858 = vrot.lane.b32.xlu2 %v2102_v34, %s1418_s28 }
 0x3f7   :  { %914 = vrot.lane.b32.xlu1 %v2110_v15, %s1421_s0  ;;  %946 = vrot.lane.b32.xlu0 %v2110_v15, %s1422_s29 }
 0x3f8   :  { %910 = vrot.lane.b32.xlu2 %v2102_v34, %s1421_s0 }
 0x3ff   :  { %942 = vrot.lane.b32.xlu1 %v2102_v34, %s1422_s29  ;;  %1006 = vrot.lane.b32.xlu0 %v2102_v34, %s1426_s3 }
 0x400   :  { %978 = vrot.lane.b32.xlu2 %v2110_v15, %s1424_s30 }
 0x407   :  { %974 = vrot.lane.b32.xlu1 %v2102_v34, %s1424_s30  ;;  %1021 = vperm.xlu0 %1263, %v1955_v11  }
 0x408   :  { %1010 = vrot.lane.b32.xlu2 %v2110_v15, %s1426_s3 }
 0x40f   :  { %993 = vperm.xlu1 %1262, %v2017_v53   ;;  %1267 = vset.pattern.permute.xlu0 %v2446_v63 }
 0x410   :  { %1025 = vperm.xlu2 %1264, %v2017_v53  }
 0x412   :  { %v2150_v45 = vpop.permute.xlu2 %758 }
 0x417   :  { %1265 = vset.pattern.permute.xlu1 %v2446_v63 }
 0x418   :  { %1266 = vset.pattern.permute.xlu2 %v2446_v63  ;;  %v1062_v63 = vld [vmem:[#allocation2 + $0xd0] sm:$0xff] }
 0x419   :  { %1096 = vmatpush.msrb.mxu1 %v1062_v63 }
 0x41a   :  { %v2154_v19 = vpop.permute.xlu2 %912 }
 0x41b   :  { %1097 = vmatpush.msrb.mxu1 %v1061_v59  ;;  %v1057_v59 = vld [vmem:[#allocation2 + $0xa8] sm:$0xff] }
 0x41d   :  { %1098 = vmatpush.msrb.mxu1 %v1060_v32  ;;  %v1056_v32 = vld [vmem:[#allocation2 + $0xa0] sm:$0xff] }
 0x41f   :  { %1099 = vmatpush.msrb.mxu1 %v1059_v16 }
 0x421   :  { %1100 = vmatpush.msrb.mxu1 %v1058_v50 }
 0x422   :  { %v2158_v11 = vpop.permute.xlu2 %940 }
 0x423   :  { %1101 = vmatpush.msrb.mxu1 %v1057_v59  ;;  %v1053_v59 = vld [vmem:[#allocation2 + $0x88] sm:$0xff] }
 0x425   :  { %1102 = vmatpush.msrb.mxu1 %v1056_v32  ;;  %v1036_v32 = vld [vmem:[#allocation2] sm:$0xff] }
 0x426   :  { %1083 = vmatpush.msrb.mxu0 %v1036_v32  ;;  %1205 = vmatpush.msrb.mxu3 %v1036_v32 }
 0x427   :  { %1103 = vmatpush.msrb.mxu1 %v1055_v10 }
 0x429   :  { %v2160_v36 = vpop.permute.xlu0 %762  ;;  %v2162_v58 = vpop.permute.xlu1 %792  ;;  %1104 = vmatpush.msrb.mxu1 %v1054_v52 }
 0x42a   :  { %v2168_v53 = vpop.permute.xlu2 %972  ;;  %v766_v10 = vsel %vm116_vm0, %v2150_v45, %v2160_v36  ;;  %v768_v6 = vsel %vm116_vm0, %v2160_v36, %v2150_v45 }
 0x42b   :  { %1105 = vmatpush.msrb.mxu1 %v1053_v59  ;;  %v770_v45 = vmul.f32 %v768_v6, %v1599_v33  ;;  %v771_v36 = vmul.f32 %v766_v10, %v1618_v39 }
 0x42d   :  { %v784_v34 = vmul.f32 %v2046_v57, %v770_v45 }
 0x431   :  { %v2164_v61 = vpop.permute.xlu0 %796  ;;  %v2166_v54 = vpop.permute.xlu1 %824 }
 0x432   :  { %v2174_v30 = vpop.permute.xlu2 %760  ;;  %v800_v9 = vsel %vm136_vm1, %v2162_v58, %v2164_v61  ;;  %v802_v2 = vsel %vm136_vm1, %v2164_v61, %v2162_v58 }
 0x433   :  { %v804_v58 = vmul.f32 %v802_v2, %v1615_v38  ;;  %v805_v52 = vmul.f32 %v800_v9, %v1632_v44 }
 0x435   :  { %v816_v17 = vmul.f32 %v2060_v5, %v804_v58  ;;  %v817_v2 = vmul.f32 %v2060_v5, %v805_v52  ;;  %v889_v58 = vmul.f32 %v2076_v27, %v1671_v14  ;;  %v888_v52 = vmul.f32 %v2074_v42, %v1668_v13 }
 0x437   :  { %v820_v12 = vadd.f32 %v816_v17, %v784_v34  ;;  %v901_v17 = vmul.f32 %v2054_v28, %v889_v58 }
 0x439   :  { %v2170_v24 = vpop.permute.xlu0 %828  ;;  %v2172_v60 = vpop.permute.xlu1 %856 }
 0x43a   :  { %v2180_v1 = vpop.permute.xlu2 %798  ;;  %v832_v61 = vsel %vm155_vm2, %v2166_v54, %v2170_v24 }
 0x441   :  { %v2176_v48 = vpop.permute.xlu0 %860  ;;  %v2178_v4 = vpop.permute.xlu1 %944 }
 0x442   :  { %v2186_v37 = vpop.permute.xlu2 %830  ;;  %v864_v41 = vsel %vm174_vm3, %v2172_v60, %v2176_v48  ;;  %v866_v9 = vsel %vm174_vm3, %v2176_v48, %v2172_v60  ;;  %v785_v60 = vmul.f32 %v2046_v57, %v771_v36 }
 0x443   :  { %v868_v6 = vmul.f32 %v866_v9, %v1651_v56  ;;  %v869_v15 = vmul.f32 %v864_v41, %v1657_v62 }
 0x444   :  { %v821_v5 = vadd.f32 %v817_v2, %v785_v60  ;;  %v900_v2 = vmul.f32 %v2054_v28, %v888_v52 }
 0x445   :  { %v880_v0 = vmul.f32 %v2064_v21, %v868_v6 }
 0x449   :  { %v2182_v3 = vpop.permute.xlu0 %908  ;;  %v2184_v51 = vpop.permute.xlu1 %976 }
 0x44a   :  { %v2200_v50 = vpop.permute.xlu2 %858  ;;  %v916_v57 = vsel %vm205_vm4, %v2182_v3, %v2154_v19  ;;  %v982_v28 = vsel %vm243_vm6, %v2184_v51, %v2168_v53 }
 0x451   :  { %v2188_v55 = vpop.permute.xlu0 %1008  ;;  %v2190_v63 = vpop.permute.xlu1 %1004 }
 0x452   :  { %2448 = vst [vmem:[#allocation22_spill] sm:$0xff] %v2188_v55  ;;  %v834_v55 = vsel %vm155_vm2, %v2170_v24, %v2166_v54  ;;  %v837_v24 = vmul.f32 %v832_v61, %v1637_v46  ;;  %v881_v61 = vmul.f32 %v2064_v21, %v869_v15 }
 0x453   :  { %2449 = vst [vmem:[#allocation23_spill] sm:$0xff] %v2190_v63  ;;  %v1052_v63 = vld [vmem:[#allocation2 + $0x80] sm:$0xff]  ;;  %v836_v54 = vmul.f32 %v834_v55, %v1622_v40 }
 0x454   :  { %1106 = vmatpush.msrb.mxu1 %v1052_v63  ;;  %v849_v48 = vmul.f32 %v2050_v49, %v837_v24  ;;  %v2240_v63 = vpop.permute.xlu2 %910 }
 0x455   :  { %v848_v55 = vmul.f32 %v2050_v49, %v836_v54  ;;  %v918_v49 = vsel %vm205_vm4, %v2154_v19, %v2182_v3  ;;  %v948_v19 = vsel %vm224_vm5, %v2158_v11, %v2178_v4  ;;  %v920_v3 = vmul.f32 %v916_v57, %v1680_v18 }
 0x456   :  { %v853_v32 = vadd.f32 %v849_v48, %v821_v5  ;;  %v952_v6 = vmul.f32 %v948_v19, %v1693_v35 }
 0x457   :  { %v852_v15 = vadd.f32 %v848_v55, %v820_v12 }
 0x458   :  { %v885_v24 = vadd.f32 %v881_v61, %v853_v32 }
 0x459   :  { %v765_v16 = vpop.permute.xlu1 %764  ;;  %v795_v8 = vpop.permute.xlu0 %794  ;;  %v884_v54 = vadd.f32 %v880_v0, %v852_v15  ;;  %v985_v0 = vmul.f32 %v982_v28, %v1728_v31  ;;  %v2451_v15 = vld [vmem:[#allocation20_spill] sm:$0xff] }
 0x45a   :  { %v767_v27 = vsel %vm116_vm0, %v2174_v30, %v765_v16  ;;  %v769_v42 = vsel %vm116_vm0, %v765_v16, %v2174_v30  ;;  %v801_v21 = vsel %vm136_vm1, %v795_v8, %v2180_v1  ;;  %v803_v34 = vsel %vm136_vm1, %v2180_v1, %v795_v8 }
 0x45b   :  { %v950_v30 = vsel %vm224_vm5, %v2178_v4, %v2158_v11  ;;  %v921_v16 = vmul.f32 %v918_v49, %v1683_v20  ;;  %v772_v41 = vmul.f32 %v769_v42, %v1599_v33  ;;  %v773_v9 = vmul.f32 %v767_v27, %v1618_v39 }
 0x45c   :  { %v806_v11 = vmul.f32 %v803_v34, %v1615_v38  ;;  %v807_v4 = vmul.f32 %v801_v21, %v1632_v44  ;;  %v932_v39 = vmul.f32 %v2056_v7, %v920_v3  ;;  %v980_v44 = vsel %vm243_vm6, %v2168_v53, %v2184_v51  ;;  %v2308_v48 = vpop.permute.xlu2 %978 }
 0x45d   :  { %v933_v38 = vmul.f32 %v2056_v7, %v921_v16  ;;  %v786_v60 = vmul.f32 %v2048_v23, %v772_v41  ;;  %v904_v7 = vadd.f32 %v900_v2, %v884_v54  ;;  %v905_v12 = vadd.f32 %v901_v17, %v885_v24  ;;  %v2453_v16 = vld [vmem:[#allocation23_spill] sm:$0xff] }
 0x45e   :  { %v819_v55 = vmul.f32 %v2062_v22, %v807_v4  ;;  %v891_v32 = vmul.f32 %v2451_v15, %v1671_v14 }
 0x45f   :  { %v936_v58 = vadd.f32 %v932_v39, %v904_v7  ;;  %v937_v52 = vadd.f32 %v933_v38, %v905_v12 }
 0x461   :  { %v863_v59 = vpop.permute.xlu1 %862  ;;  %v827_v10 = vpop.permute.xlu0 %826 }
 0x462   :  { %v833_v8 = vsel %vm155_vm2, %v827_v10, %v2186_v37  ;;  %v835_v1 = vsel %vm155_vm2, %v2186_v37, %v827_v10  ;;  %v953_v37 = vmul.f32 %v950_v30, %v1705_v47  ;;  %v865_v5 = vsel %vm174_vm3, %v2200_v50, %v863_v59 }
 0x463   :  { %v838_v10 = vmul.f32 %v835_v1, %v1622_v40  ;;  %v839_v33 = vmul.f32 %v833_v8, %v1637_v46  ;;  %v787_v40 = vmul.f32 %v2048_v23, %v773_v9  ;;  %v818_v46 = vmul.f32 %v2062_v22, %v806_v11  ;;  %v2454_v1 = vld [vmem:[#allocation17_spill] sm:$0xff]  ;;  %v2455_v11 = vld [vmem:[#allocation16_spill] sm:$0xff] }
 0x464   :  { %v867_v53 = vsel %vm174_vm3, %v863_v59, %v2200_v50  ;;  %v984_v22 = vmul.f32 %v980_v44, %v1717_v26  ;;  %v871_v21 = vmul.f32 %v865_v5, %v1657_v62  ;;  %v964_v50 = vmul.f32 %v2070_v43, %v952_v6  ;;  %v2452_v62 = vld [vmem:[#allocation22_spill] sm:$0xff]  ;;  %v2457_v5 = vld [vmem:[#allocation21_spill] sm:$0xff] }
 0x465   :  { %v850_v51 = vmul.f32 %v2052_v25, %v838_v10  ;;  %v851_v23 = vmul.f32 %v2052_v25, %v839_v33  ;;  %v822_v49 = vadd.f32 %v818_v46, %v786_v60  ;;  %v823_v27 = vadd.f32 %v819_v55, %v787_v40  ;;  %v2450_v25 = vld [vmem:[#allocation19_spill] sm:$0xff]  ;;  %v1276_v10 = vld [vmem:[%s2399_s1 + $0x10] ss:$0 sm:$0xff] }
 0x466   :  { %v870_v42 = vmul.f32 %v867_v53, %v1651_v56  ;;  %v965_v59 = vmul.f32 %v2070_v43, %v953_v37  ;;  %v890_v34 = vmul.f32 %v2450_v25, %v1668_v13  ;;  %v1012_v43 = vsel %vm262_vm7, %v2453_v16, %v2452_v62  ;;  %v1011_v37 = vpop.permute.xlu2 %1010 }
 0x467   :  { %v854_v19 = vadd.f32 %v850_v51, %v822_v49  ;;  %v855_v30 = vadd.f32 %v851_v23, %v823_v27  ;;  %v1014_v13 = vsel %vm262_vm7, %v2452_v62, %v2453_v16  ;;  %v968_v14 = vadd.f32 %v964_v50, %v936_v58  ;;  %v2458_v49 = vld [vmem:[#allocation18_spill] sm:$0xff] }
 0x468   :  { %v969_v8 = vadd.f32 %v965_v59, %v937_v52  ;;  %v996_v41 = vmul.f32 %v2454_v1, %v984_v22  ;;  %v997_v9 = vmul.f32 %v2454_v1, %v985_v0  ;;  %v882_v4 = vmul.f32 %v2455_v11, %v870_v42 }
 0x469   :  { %v915_v45 = vpop.permute.xlu1 %914  ;;  %v947_v36 = vpop.permute.xlu0 %946  ;;  %v1016_v33 = vmul.f32 %v1276_v10, %v1012_v43 }
 0x46a   :  { %v917_v3 = vsel %vm205_vm4, %v2240_v63, %v915_v45  ;;  %v919_v56 = vsel %vm205_vm4, %v915_v45, %v2240_v63  ;;  %v883_v63 = vmul.f32 %v2455_v11, %v871_v21  ;;  %v886_v2 = vadd.f32 %v882_v4, %v854_v19  ;;  %v1114_v4 = vld [vmem:[%s2408_s10] sm:$0xff] }
 0x46b   :  { %v922_v45 = vmul.f32 %v917_v3, %v1680_v18  ;;  %v923_v54 = vmul.f32 %v919_v56, %v1683_v20  ;;  %v1277_v18 = vld [vmem:[%s2399_s1 + $0x18] ss:$0 sm:$0xff]  ;;  %v1001_v40 = vadd.f32 %v997_v9, %v969_v8 }
 0x46c   :  { %v887_v6 = vadd.f32 %v883_v63, %v855_v30  ;;  %v1017_v39 = vmul.f32 %v1277_v18, %v1014_v13  ;;  %v2456_v20 = vld [vmem:[#allocation15_spill] sm:$0xff]  ;;  %v1115_v63 = vld [vmem:[%s2408_s10 + $0x8] sm:$0xff] }
 0x46d   :  { %v902_v38 = vmul.f32 %v2456_v20, %v890_v34  ;;  %v903_v44 = vmul.f32 %v2456_v20, %v891_v32  ;;  %v934_v53 = vmul.f32 %v2457_v5, %v922_v45  ;;  %v935_v51 = vmul.f32 %v2457_v5, %v923_v54 }
 0x46e   :  { %v1026_v15 = vpop.permute.xlu2 %1025 }
 0x46f   :  { %v906_v23 = vadd.f32 %v902_v38, %v886_v2  ;;  %v907_v58 = vadd.f32 %v903_v44, %v887_v6 }
 0x471   :  { %v943_v61 = vpop.permute.xlu1 %942  ;;  %v1007_v57 = vpop.permute.xlu0 %1006  ;;  %v938_v21 = vadd.f32 %v934_v53, %v906_v23  ;;  %v939_v50 = vadd.f32 %v935_v51, %v907_v58 }
 0x472   :  { %v949_v24 = vsel %vm224_vm5, %v943_v61, %v947_v36  ;;  %v951_v17 = vsel %vm224_vm5, %v947_v36, %v943_v61  ;;  %v1000_v36 = vadd.f32 %v996_v41, %v968_v14  ;;  %v1013_v0 = vsel %vm262_vm7, %v1007_v57, %v1011_v37 }
 0x473   :  { %v954_v46 = vmul.f32 %v949_v24, %v1693_v35  ;;  %v955_v55 = vmul.f32 %v951_v17, %v1705_v47  ;;  %v1015_v61 = vsel %vm262_vm7, %v1011_v37, %v1007_v57  ;;  %v1018_v59 = vmul.f32 %v1276_v10, %v1013_v0 }
 0x474   :  { %v1019_v25 = vmul.f32 %v1277_v18, %v1015_v61 }
 0x475   :  { %v966_v27 = vmul.f32 %v2458_v49, %v954_v46  ;;  %v967_v42 = vmul.f32 %v2458_v49, %v955_v55  ;;  %v1030_v3 = vmul.f32 %v1026_v15, %v1018_v59 }
 0x476   :  { %v1031_v56 = vmul.f32 %v1026_v15, %v1019_v25 }
 0x477   :  { %v970_v19 = vadd.f32 %v966_v27, %v938_v21 }
 0x479   :  { %v975_v28 = vpop.permute.xlu1 %974  ;;  %v1022_v60 = vpop.permute.xlu0 %1021 }
 0x47a   :  { %v1028_v7 = vmul.f32 %v1022_v60, %v1016_v33  ;;  %v1029_v12 = vmul.f32 %v1022_v60, %v1017_v39  ;;  %v981_v35 = vsel %vm243_vm6, %v975_v28, %v2308_v48  ;;  %v983_v47 = vsel %vm243_vm6, %v2308_v48, %v975_v28 }
 0x47b   :  { %v986_v57 = vmul.f32 %v981_v35, %v1717_v26  ;;  %v987_v34 = vmul.f32 %v983_v47, %v1728_v31  ;;  %v971_v48 = vadd.f32 %v967_v42, %v939_v50  ;;  %v1116_v26 = vld [vmem:[%s2409_s11] sm:$0xff]  ;;  %v1117_v31 = vld [vmem:[%s2409_s11 + $0x8] sm:$0xff]  ;;  %s1430_s11 = smov [#allocation10]  }
 0x47c   :  { %v1032_v52 = vadd.f32 %v1028_v7, %v1000_v36  ;;  %v1033_v22 = vadd.f32 %v1029_v12, %v1001_v40  ;;  %1120 = vperm.xlu1 %1265, %v1116_v26   ;;  %1125 = vperm.xlu2 %1266, %v1117_v31   ;;  %s1163_s7 = sshll.u32 %s1430_s11, 4  ;;  %s1164_s7 = int_to_ptr.vmem [resolvable:$true] %s1163_s7 }
 0x47e   :  { %1084 = vmatmul.f32.vlgmr.msrb.gmra.mxu0 %v1032_v52  ;;  %1107 = vmatmul.f32.vlgmr.msrb.gmra.mxu1 %v1033_v22 }
 0x481   :  { %v994_v32 = vpop.permute.xlu1 %993 }
 0x482   :  { %v998_v30 = vmul.f32 %v994_v32, %v986_v57  ;;  %v999_v29 = vmul.f32 %v994_v32, %v987_v34 }
 0x484   :  { %v1002_v62 = vadd.f32 %v998_v30, %v970_v19  ;;  %v1003_v16 = vadd.f32 %v999_v29, %v971_v48 }
 0x486   :  { %v1034_v43 = vadd.f32 %v1030_v3, %v1002_v62  ;;  %v1035_v13 = vadd.f32 %v1031_v56, %v1003_v16 }
 0x488   :  { %1087 = vmatmul.f32.vlgmr.msrb.gmra.mxu3 %v1034_v43  ;;  %1110 = vmatmul.f32.gmra.mxu1 %v1035_v13 }
 0x4d6   :  { %v1126_v17 = vpop.permute.xlu2 %1125 }
 0x4ee   :  { %v1121_v45 = vpop.permute.xlu1 %1120 }
 0x4fb   :  { %v1108_v14 = vpop.f32.mrf.mxu1  ;;  %v1085_v8 = vpop.f32.mrf.mxu0 }
 0x4fc   :  { %v1109_v11 = vadd.f32 %v1108_v14, %v1085_v8 }
 0x505   :  { %v1111_v1 = vpop.f32.mrf.mxu1 }
 0x50b   :  { %v1088_v41 = vpop.f32.mrf.mxu3 }
 0x50c   :  { %v1112_v9 = vadd.f32 %v1111_v1, %v1088_v41 }
 0x50e   :  { %1148 = vmatpush.msrb.mxu2 %v1112_v9 }
 0x510   :  { %1149 = vmatpush.msrb.mxu2 %v1109_v11 }
 0x511   :  { %1188 = vmatmul.msk.f32.vlgmr.msrb.gmra.mxu2 %vm642_vm9, %v1114_v4 }
 0x519   :  { %1189 = vmatmul.msk.f32.gmra.mxu2 %vm642_vm9, %v1115_v63 }
 0x594   :  { %v1151_v54 = vpop.f32.mrf.mxu2 }
 0x595   :  { %v1152_v24 = vadd.f32 %v1151_v54, %v1121_v45 }
 0x597   :  { %1157 = vst [vmem:[#allocation10] sm:$0xff] %v1152_v24 }
 0x59c   :  { %v1154_v2 = vpop.f32.mrf.mxu2 }
 0x59d   :  { %v1155_v6 = vadd.f32 %v1154_v2, %v1126_v17 }
 0x59f   :  { %1158 = vst [vmem:[#allocation10 + $0x8] sm:$0xff] %v1155_v6 }
 0x5a0   :  { %1171 = dma.vmem_to_hbm [thread:$0]  %s1164_s7, 256, %s1166_s26, [#allocation4], %s1408_s13, %s1408_s13, %s1409_s14  }
 0x5a1   :  { %1404 = dma.done.wait [#allocation4], 256  }
 0x5a2   :  { %1405 = vsyncadd [#allocation4], 4294967040 }
 0x5a3   :  { %1176 = vsyncpa [#allocation3], 1 }
 0x5a4   :  { %1177 = vsyncpa [#allocation6], 1 }
 0x5a5   :  { %1178 = vsyncpa [#allocation9], 1 }
 0x5a6   :  { %1179 = vsyncpa [#allocation4], 1 }

</bundles_post_ra>
